<compile_context>
chip_gen: v7x
topology: tpu7x:2x2x1
jax: 0.10.0
libtpu: 0.0.40
codegen_flags: <defaults>
</compile_context>

<pallas_src>
import jax
import jax.numpy as jnp
from jax import lax
from jax.experimental import pallas as pl
from jax.experimental.pallas import tpu as pltpu

KH = KW = 4              # kernel size of self.D = nn.Conv2d(512, 1, 4, padding=1)
PAD_LO, PAD_HI = 2, 1    # ZeroPad2d((1,0,1,0)) + Conv2d(padding=1): top/left=2, bottom/right=1


def _round_up(n, m):
    return ((n + m - 1) // m) * m


# ----------------------------------------------------------------------------
# Pallas kernel: per-sample 4x4 conv, 512 -> 1 channel, padding fused in-kernel.
# ----------------------------------------------------------------------------
def _d_head_kernel(x_ref, w_ref, b_ref, o_ref, xp_ref):
    """x_ref : (Hs, Ws, C)     VMEM, unpadded NHWC logits of one sample
       w_ref : (KH*KW, W8, C)  VMEM, tap-major weights pre-broadcast across sublanes
       b_ref : (1,)            SMEM, bias scalar
       o_ref : (Hs, Ws)        VMEM, output logits of one sample
       xp_ref: (Hp, W8, C)     VMEM scratch: zero-padded input (W padded to mult. of 8)
    """
    Hs, Ws, C = x_ref.shape
    _, W8, _ = xp_ref.shape

    # Fused ZeroPad2d((1,0,1,0)) + conv padding=1 -> top/left=2, bottom/right=1.
    # One full-tile memset + interior copy is the minimal vst count here: a
    # halo-only zero would need the same number of (masked) stores.
    xp_ref[...] = jnp.zeros_like(xp_ref)
    xp_ref[PAD_LO:PAD_LO + Hs, PAD_LO:PAD_LO + Ws, :] = x_ref[...]

    # Per-kw accumulation over kh, channel axis kept (pure VPU).  Every scratch
    # read is an aligned full-sublane band; weights arrive pre-broadcast so the
    # only implicit broadcast is along the free major (Hs) axis.
    parts = []
    for kw in range(KW):
        acc = xp_ref[0:Hs, :, :] * w_ref[kw]                    # kh = 0 (f32 accumulate)
        for kh in range(1, KH):
            band = xp_ref[kh:kh + Hs, :, :]                     # (Hs, W8, C) full-tile load
            acc = acc + band * w_ref[kh * KW + kw]
        parts.append(jnp.sum(acc, axis=-1))                     # (Hs, W8) channel reduce (XLU)

    # Shift-and-sum over kw on the tiny channel-reduced partials only.
    out = parts[0][:, 0:Ws]
    for kw in range(1, KW):
        out = out + parts[kw][:, kw:kw + Ws]
    o_ref[...] = out + b_ref[0]


def discriminator_head(d_logit1_nhwc, w_oihw, bias):
    """self.D(self.pad(D_logit1)) : (B, Hs, Ws, 512) NHWC -> (B, 1, Hs, Ws) NCHW."""
    B, Hs, Ws, C = d_logit1_nhwc.shape
    Hp = Hs + PAD_LO + PAD_HI
    W8 = _round_up(Ws + PAD_LO + PAD_HI, 8)

    # torch OIHW (1, C, KH, KW) -> tap-major (KH*KW, C) with
    # w_kc[kh*KW+kw, c] = w[0, c, kh, kw]; then pre-broadcast across the W/sublane
    # axis so the kernel never materializes a per-tap weight broadcast.
    w_kc = jnp.transpose(w_oihw[0], (1, 2, 0)).reshape(KH * KW, C)
    w_b = jnp.broadcast_to(w_kc[:, None, :], (KH * KW, W8, C)).astype(jnp.float32)

    flops = 2 * B * Hs * Ws * C * KH * KW
    bytes_accessed = (d_logit1_nhwc.size * d_logit1_nhwc.dtype.itemsize
                      + w_b.size * 4 + B * Hs * Ws * 4)

    out = pl.pallas_call(
        _d_head_kernel,
        out_shape=jax.ShapeDtypeStruct((B, Hs, Ws), jnp.float32),
        grid=(B,),                                   # one sample per step
        in_specs=[
            pl.BlockSpec((None, Hs, Ws, C), lambda b: (b, 0, 0, 0)),
            pl.BlockSpec((KH * KW, W8, C), lambda b: (0, 0, 0)),   # same block -> fetched once
            pl.BlockSpec(memory_space=pltpu.SMEM),
        ],
        out_specs=pl.BlockSpec((None, Hs, Ws), lambda b: (b, 0, 0)),
        scratch_shapes=[pltpu.VMEM((Hp, W8, C), d_logit1_nhwc.dtype)],
        compiler_params=pltpu.CompilerParams(dimension_semantics=("parallel",)),
        cost_estimate=pl.CostEstimate(flops=flops, transcendentals=0,
                                      bytes_accessed=bytes_accessed),
    )(d_logit1_nhwc, w_b, bias)
    return out.reshape(B, 1, Hs, Ws)


# ----------------------------------------------------------------------------
# Deterministic stand-in for unetPlusPlus(6, 2) (plain-JAX glue).
# ----------------------------------------------------------------------------
def _conv(x, w, b, stride, pad, dn=("NCHW", "OIHW", "NCHW")):
    y = lax.conv_general_dilated(
        x, w, (stride, stride), [(pad, pad), (pad, pad)], dimension_numbers=dn)
    if dn[2] == "NHWC":
        return y + b.reshape(1, 1, 1, -1)
    return y + b.reshape(1, -1, 1, 1)


def init_params(key):
    ks = jax.random.split(key, 8)

    def w(k, o, i, kh, kw):
        return jax.random.normal(k, (o, i, kh, kw), jnp.float32) / jnp.sqrt(i * kh * kw)

    return {
        # CD_model stand-in encoder (downsample x16, 6 -> 512 channels)
        "e1_w": w(ks[0], 64, 6, 3, 3),    "e1_b": jnp.zeros((64,), jnp.float32),
        "e2_w": w(ks[1], 128, 64, 3, 3),  "e2_b": jnp.zeros((128,), jnp.float32),
        "e3_w": w(ks[2], 256, 128, 3, 3), "e3_b": jnp.zeros((256,), jnp.float32),
        "e4_w": w(ks[3], 512, 256, 3, 3), "e4_b": jnp.zeros((512,), jnp.float32),
        # CD_model stand-in segmentation head (full-res, 2 channels)
        "o5_w": w(ks[4], 2, 6, 3, 3),     "o5_b": jnp.zeros((2,), jnp.float32),
        # self.D = nn.Conv2d(512, 1, 4, padding=1)
        "d_w": w(ks[5], 1, 512, 4, 4),
        "d_b": jax.random.normal(ks[6], (1,), jnp.float32) * 0.01,
    }


def cd_model_standin(img, p):
    h = jax.nn.leaky_relu(_conv(img, p["e1_w"], p["e1_b"], 2, 1), 0.2)
    h = jax.nn.leaky_relu(_conv(h, p["e2_w"], p["e2_b"], 2, 1), 0.2)
    h = jax.nn.leaky_relu(_conv(h, p["e3_w"], p["e3_b"], 2, 1), 0.2)
    # Last encoder conv emits NHWC directly so the Pallas head needs no transpose.
    d_logit1 = jax.nn.leaky_relu(
        _conv(h, p["e4_w"], p["e4_b"], 2, 1, dn=("NCHW", "OIHW", "NHWC")), 0.2)
    output5 = _conv(img, p["o5_w"], p["o5_b"], 1, 1)
    return d_logit1, output5


def discriminator_forward(img, p):
    d_logit1, output5 = cd_model_standin(img, p)
    d_logit = discriminator_head(d_logit1, p["d_w"], p["d_b"])
    return [d_logit, output5]


# ----------------------------------------------------------------------------
if __name__ == "__main__":
    key = jax.random.PRNGKey(0)
    k_img, k_par = jax.random.split(key)

    B, Cin, H, W = 2, 6, 64, 64            # unetPlusPlus(6, 2) => 6 input channels
    img = jax.random.normal(k_img, (B, Cin, H, W), jnp.float32)
    params = init_params(k_par)

    fwd = jax.jit(discriminator_forward)
    d_logit, output5 = fwd(img, params)
    jax.block_until_ready((d_logit, output5))

    # shape contract: output_shape = (1, H // 2**4, W // 2**4)
    assert d_logit.shape == (B, 1, H // 16, W // 16), d_logit.shape
    assert output5.shape == (B, 2, H, W), output5.shape

    # numerical check of the Pallas head against a lax.conv reference
    d_logit1, _ = cd_model_standin(img, params)
    d_logit1_nchw = jnp.transpose(d_logit1, (0, 3, 1, 2))
    padded = jnp.pad(d_logit1_nchw, ((0, 0), (0, 0), (2, 1), (2, 1)))
    ref = lax.conv_general_dilated(
        padded, params["d_w"], (1, 1), "VALID",
        dimension_numbers=("NCHW", "OIHW", "NCHW")) + params["d_b"].reshape(1, 1, 1, 1)
    assert jnp.allclose(d_logit, ref, rtol=1e-3, atol=1e-3), \
        float(jnp.max(jnp.abs(d_logit - ref)))

    print("KERNEL_OK")
</pallas_src>

<mosaic_0001>
module attributes {stable_mosaic.version = 11 : i64} {
  func.func @_d_head_kernel(%arg0: i32, %arg1: memref<1x4x4x512xf32, #tpu.memory_space<vmem>>, %arg2: memref<16x8x512xf32, #tpu.memory_space<vmem>>, %arg3: memref<1xf32, #tpu.memory_space<smem>>, %arg4: memref<1x4x4xf32, #tpu.memory_space<vmem>>, %arg5: memref<7x8x512xf32, #tpu.memory_space<vmem>>) attributes {dimension_semantics = [#tpu.dimension_semantics<parallel>], iteration_bounds = array<i64: 2>, scalar_prefetch = 0 : i64, scratch_operands = 1 : i64, tpu.core_type = #tpu.core_type<tc>, window_params = [{transform_indices = @transform_0, window_bounds = array<i64: 1, 4, 4, 512>}, {pipeline_mode = #tpu.pipeline_mode<synchronous>, transform_indices = @transform_1, window_bounds = array<i64: 16, 8, 512>}, {transform_indices = @transform_2, window_bounds = array<i64: 1>}, {transform_indices = @transform_3, window_bounds = array<i64: 1, 4, 4>}]} {
    %cst = arith.constant 0.000000e+00 : f32
    %0 = vector.broadcast %cst : f32 to vector<7x8x512xf32>
    %c0 = arith.constant 0 : index
    %c0_0 = arith.constant 0 : index
    %c0_1 = arith.constant 0 : index
    %1 = vector.load %arg5[%c0, %c0_0, %c0_1] : memref<7x8x512xf32, #tpu.memory_space<vmem>>, vector<7x8x512xf32>
    tpu.vector_store %arg5[%c0, %c0_0, %c0_1], %0 {strides = array<i32>} : memref<7x8x512xf32, #tpu.memory_space<vmem>>, vector<7x8x512xf32>,
    %c0_2 = arith.constant 0 : index
    %c0_3 = arith.constant 0 : index
    %c0_4 = arith.constant 0 : index
    %c0_5 = arith.constant 0 : index
    %2 = vector.load %arg1[%c0_2, %c0_3, %c0_4, %c0_5] : memref<1x4x4x512xf32, #tpu.memory_space<vmem>>, vector<1x4x4x512xf32>
    %3 = vector.shape_cast %2 : vector<1x4x4x512xf32> to vector<4x4x512xf32>
    %c2 = arith.constant 2 : index
    %c2_6 = arith.constant 2 : index
    %c0_7 = arith.constant 0 : index
    %4 = vector.load %arg5[%c2, %c2_6, %c0_7] : memref<7x8x512xf32, #tpu.memory_space<vmem>>, vector<4x4x512xf32>
    tpu.vector_store %arg5[%c2, %c2_6, %c0_7], %3 {strides = array<i32>} : memref<7x8x512xf32, #tpu.memory_space<vmem>>, vector<4x4x512xf32>,
    %c0_8 = arith.constant 0 : index
    %c0_9 = arith.constant 0 : index
    %c0_10 = arith.constant 0 : index
    %5 = vector.load %arg5[%c0_8, %c0_9, %c0_10] : memref<7x8x512xf32, #tpu.memory_space<vmem>>, vector<4x8x512xf32>
    %c0_11 = arith.constant 0 : index
    %c0_12 = arith.constant 0 : index
    %c0_13 = arith.constant 0 : index
    %6 = vector.load %arg2[%c0_11, %c0_12, %c0_13] : memref<16x8x512xf32, #tpu.memory_space<vmem>>, vector<1x8x512xf32>
    %7 = vector.shape_cast %6 : vector<1x8x512xf32> to vector<8x512xf32>
    %8 = vector.shape_cast %7 : vector<8x512xf32> to vector<1x8x512xf32>
    %9 = vector.broadcast %8 : vector<1x8x512xf32> to vector<4x8x512xf32>
    %10 = arith.mulf %5, %9 : vector<4x8x512xf32>
    %c1 = arith.constant 1 : index
    %c0_14 = arith.constant 0 : index
    %c0_15 = arith.constant 0 : index
    %11 = vector.load %arg5[%c1, %c0_14, %c0_15] : memref<7x8x512xf32, #tpu.memory_space<vmem>>, vector<4x8x512xf32>
    %c4 = arith.constant 4 : index
    %c0_16 = arith.constant 0 : index
    %c0_17 = arith.constant 0 : index
    %12 = vector.load %arg2[%c4, %c0_16, %c0_17] : memref<16x8x512xf32, #tpu.memory_space<vmem>>, vector<1x8x512xf32>
    %13 = vector.shape_cast %12 : vector<1x8x512xf32> to vector<8x512xf32>
    %14 = vector.shape_cast %13 : vector<8x512xf32> to vector<1x8x512xf32>
    %15 = vector.broadcast %14 : vector<1x8x512xf32> to vector<4x8x512xf32>
    %16 = arith.mulf %11, %15 : vector<4x8x512xf32>
    %17 = arith.addf %10, %16 : vector<4x8x512xf32>
    %c2_18 = arith.constant 2 : index
    %c0_19 = arith.constant 0 : index
    %c0_20 = arith.constant 0 : index
    %18 = vector.load %arg5[%c2_18, %c0_19, %c0_20] : memref<7x8x512xf32, #tpu.memory_space<vmem>>, vector<4x8x512xf32>
    %c8 = arith.constant 8 : index
    %c0_21 = arith.constant 0 : index
    %c0_22 = arith.constant 0 : index
    %19 = vector.load %arg2[%c8, %c0_21, %c0_22] : memref<16x8x512xf32, #tpu.memory_space<vmem>>, vector<1x8x512xf32>
    %20 = vector.shape_cast %19 : vector<1x8x512xf32> to vector<8x512xf32>
    %21 = vector.shape_cast %20 : vector<8x512xf32> to vector<1x8x512xf32>
    %22 = vector.broadcast %21 : vector<1x8x512xf32> to vector<4x8x512xf32>
    %23 = arith.mulf %18, %22 : vector<4x8x512xf32>
    %24 = arith.addf %17, %23 : vector<4x8x512xf32>
    %c3 = arith.constant 3 : index
    %c0_23 = arith.constant 0 : index
    %c0_24 = arith.constant 0 : index
    %25 = vector.load %arg5[%c3, %c0_23, %c0_24] : memref<7x8x512xf32, #tpu.memory_space<vmem>>, vector<4x8x512xf32>
    %c12 = arith.constant 12 : index
    %c0_25 = arith.constant 0 : index
    %c0_26 = arith.constant 0 : index
    %26 = vector.load %arg2[%c12, %c0_25, %c0_26] : memref<16x8x512xf32, #tpu.memory_space<vmem>>, vector<1x8x512xf32>
    %27 = vector.shape_cast %26 : vector<1x8x512xf32> to vector<8x512xf32>
    %28 = vector.shape_cast %27 : vector<8x512xf32> to vector<1x8x512xf32>
    %29 = vector.broadcast %28 : vector<1x8x512xf32> to vector<4x8x512xf32>
    %30 = arith.mulf %25, %29 : vector<4x8x512xf32>
    %31 = arith.addf %24, %30 : vector<4x8x512xf32>
    %cst_27 = arith.constant dense<0.000000e+00> : vector<4x8xf32>
    %32 = vector.multi_reduction <add>, %31, %cst_27 [2] : vector<4x8x512xf32> to vector<4x8xf32>
    %c0_28 = arith.constant 0 : index
    %c0_29 = arith.constant 0 : index
    %c0_30 = arith.constant 0 : index
    %33 = vector.load %arg5[%c0_28, %c0_29, %c0_30] : memref<7x8x512xf32, #tpu.memory_space<vmem>>, vector<4x8x512xf32>
    %c1_31 = arith.constant 1 : index
    %c0_32 = arith.constant 0 : index
    %c0_33 = arith.constant 0 : index
    %34 = vector.load %arg2[%c1_31, %c0_32, %c0_33] : memref<16x8x512xf32, #tpu.memory_space<vmem>>, vector<1x8x512xf32>
    %35 = vector.shape_cast %34 : vector<1x8x512xf32> to vector<8x512xf32>
    %36 = vector.shape_cast %35 : vector<8x512xf32> to vector<1x8x512xf32>
    %37 = vector.broadcast %36 : vector<1x8x512xf32> to vector<4x8x512xf32>
    %38 = arith.mulf %33, %37 : vector<4x8x512xf32>
    %c1_34 = arith.constant 1 : index
    %c0_35 = arith.constant 0 : index
    %c0_36 = arith.constant 0 : index
    %39 = vector.load %arg5[%c1_34, %c0_35, %c0_36] : memref<7x8x512xf32, #tpu.memory_space<vmem>>, vector<4x8x512xf32>
    %c5 = arith.constant 5 : index
    %c0_37 = arith.constant 0 : index
    %c0_38 = arith.constant 0 : index
    %40 = vector.load %arg2[%c5, %c0_37, %c0_38] : memref<16x8x512xf32, #tpu.memory_space<vmem>>, vector<1x8x512xf32>
    %41 = vector.shape_cast %40 : vector<1x8x512xf32> to vector<8x512xf32>
    %42 = vector.shape_cast %41 : vector<8x512xf32> to vector<1x8x512xf32>
    %43 = vector.broadcast %42 : vector<1x8x512xf32> to vector<4x8x512xf32>
    %44 = arith.mulf %39, %43 : vector<4x8x512xf32>
    %45 = arith.addf %38, %44 : vector<4x8x512xf32>
    %c2_39 = arith.constant 2 : index
    %c0_40 = arith.constant 0 : index
    %c0_41 = arith.constant 0 : index
    %46 = vector.load %arg5[%c2_39, %c0_40, %c0_41] : memref<7x8x512xf32, #tpu.memory_space<vmem>>, vector<4x8x512xf32>
    %c9 = arith.constant 9 : index
    %c0_42 = arith.constant 0 : index
    %c0_43 = arith.constant 0 : index
    %47 = vector.load %arg2[%c9, %c0_42, %c0_43] : memref<16x8x512xf32, #tpu.memory_space<vmem>>, vector<1x8x512xf32>
    %48 = vector.shape_cast %47 : vector<1x8x512xf32> to vector<8x512xf32>
    %49 = vector.shape_cast %48 : vector<8x512xf32> to vector<1x8x512xf32>
    %50 = vector.broadcast %49 : vector<1x8x512xf32> to vector<4x8x512xf32>
    %51 = arith.mulf %46, %50 : vector<4x8x512xf32>
    %52 = arith.addf %45, %51 : vector<4x8x512xf32>
    %c3_44 = arith.constant 3 : index
    %c0_45 = arith.constant 0 : index
    %c0_46 = arith.constant 0 : index
    %53 = vector.load %arg5[%c3_44, %c0_45, %c0_46] : memref<7x8x512xf32, #tpu.memory_space<vmem>>, vector<4x8x512xf32>
    %c13 = arith.constant 13 : index
    %c0_47 = arith.constant 0 : index
    %c0_48 = arith.constant 0 : index
    %54 = vector.load %arg2[%c13, %c0_47, %c0_48] : memref<16x8x512xf32, #tpu.memory_space<vmem>>, vector<1x8x512xf32>
    %55 = vector.shape_cast %54 : vector<1x8x512xf32> to vector<8x512xf32>
    %56 = vector.shape_cast %55 : vector<8x512xf32> to vector<1x8x512xf32>
    %57 = vector.broadcast %56 : vector<1x8x512xf32> to vector<4x8x512xf32>
    %58 = arith.mulf %53, %57 : vector<4x8x512xf32>
    %59 = arith.addf %52, %58 : vector<4x8x512xf32>
    %cst_49 = arith.constant dense<0.000000e+00> : vector<4x8xf32>
    %60 = vector.multi_reduction <add>, %59, %cst_49 [2] : vector<4x8x512xf32> to vector<4x8xf32>
    %c0_50 = arith.constant 0 : index
    %c0_51 = arith.constant 0 : index
    %c0_52 = arith.constant 0 : index
    %61 = vector.load %arg5[%c0_50, %c0_51, %c0_52] : memref<7x8x512xf32, #tpu.memory_space<vmem>>, vector<4x8x512xf32>
    %c2_53 = arith.constant 2 : index
    %c0_54 = arith.constant 0 : index
    %c0_55 = arith.constant 0 : index
    %62 = vector.load %arg2[%c2_53, %c0_54, %c0_55] : memref<16x8x512xf32, #tpu.memory_space<vmem>>, vector<1x8x512xf32>
    %63 = vector.shape_cast %62 : vector<1x8x512xf32> to vector<8x512xf32>
    %64 = vector.shape_cast %63 : vector<8x512xf32> to vector<1x8x512xf32>
    %65 = vector.broadcast %64 : vector<1x8x512xf32> to vector<4x8x512xf32>
    %66 = arith.mulf %61, %65 : vector<4x8x512xf32>
    %c1_56 = arith.constant 1 : index
    %c0_57 = arith.constant 0 : index
    %c0_58 = arith.constant 0 : index
    %67 = vector.load %arg5[%c1_56, %c0_57, %c0_58] : memref<7x8x512xf32, #tpu.memory_space<vmem>>, vector<4x8x512xf32>
    %c6 = arith.constant 6 : index
    %c0_59 = arith.constant 0 : index
    %c0_60 = arith.constant 0 : index
    %68 = vector.load %arg2[%c6, %c0_59, %c0_60] : memref<16x8x512xf32, #tpu.memory_space<vmem>>, vector<1x8x512xf32>
    %69 = vector.shape_cast %68 : vector<1x8x512xf32> to vector<8x512xf32>
    %70 = vector.shape_cast %69 : vector<8x512xf32> to vector<1x8x512xf32>
    %71 = vector.broadcast %70 : vector<1x8x512xf32> to vector<4x8x512xf32>
    %72 = arith.mulf %67, %71 : vector<4x8x512xf32>
    %73 = arith.addf %66, %72 : vector<4x8x512xf32>
    %c2_61 = arith.constant 2 : index
    %c0_62 = arith.constant 0 : index
    %c0_63 = arith.constant 0 : index
    %74 = vector.load %arg5[%c2_61, %c0_62, %c0_63] : memref<7x8x512xf32, #tpu.memory_space<vmem>>, vector<4x8x512xf32>
    %c10 = arith.constant 10 : index
    %c0_64 = arith.constant 0 : index
    %c0_65 = arith.constant 0 : index
    %75 = vector.load %arg2[%c10, %c0_64, %c0_65] : memref<16x8x512xf32, #tpu.memory_space<vmem>>, vector<1x8x512xf32>
    %76 = vector.shape_cast %75 : vector<1x8x512xf32> to vector<8x512xf32>
    %77 = vector.shape_cast %76 : vector<8x512xf32> to vector<1x8x512xf32>
    %78 = vector.broadcast %77 : vector<1x8x512xf32> to vector<4x8x512xf32>
    %79 = arith.mulf %74, %78 : vector<4x8x512xf32>
    %80 = arith.addf %73, %79 : vector<4x8x512xf32>
    %c3_66 = arith.constant 3 : index
    %c0_67 = arith.constant 0 : index
    %c0_68 = arith.constant 0 : index
    %81 = vector.load %arg5[%c3_66, %c0_67, %c0_68] : memref<7x8x512xf32, #tpu.memory_space<vmem>>, vector<4x8x512xf32>
    %c14 = arith.constant 14 : index
    %c0_69 = arith.constant 0 : index
    %c0_70 = arith.constant 0 : index
    %82 = vector.load %arg2[%c14, %c0_69, %c0_70] : memref<16x8x512xf32, #tpu.memory_space<vmem>>, vector<1x8x512xf32>
    %83 = vector.shape_cast %82 : vector<1x8x512xf32> to vector<8x512xf32>
    %84 = vector.shape_cast %83 : vector<8x512xf32> to vector<1x8x512xf32>
    %85 = vector.broadcast %84 : vector<1x8x512xf32> to vector<4x8x512xf32>
    %86 = arith.mulf %81, %85 : vector<4x8x512xf32>
    %87 = arith.addf %80, %86 : vector<4x8x512xf32>
    %cst_71 = arith.constant dense<0.000000e+00> : vector<4x8xf32>
    %88 = vector.multi_reduction <add>, %87, %cst_71 [2] : vector<4x8x512xf32> to vector<4x8xf32>
    %c0_72 = arith.constant 0 : index
    %c0_73 = arith.constant 0 : index
    %c0_74 = arith.constant 0 : index
    %89 = vector.load %arg5[%c0_72, %c0_73, %c0_74] : memref<7x8x512xf32, #tpu.memory_space<vmem>>, vector<4x8x512xf32>
    %c3_75 = arith.constant 3 : index
    %c0_76 = arith.constant 0 : index
    %c0_77 = arith.constant 0 : index
    %90 = vector.load %arg2[%c3_75, %c0_76, %c0_77] : memref<16x8x512xf32, #tpu.memory_space<vmem>>, vector<1x8x512xf32>
    %91 = vector.shape_cast %90 : vector<1x8x512xf32> to vector<8x512xf32>
    %92 = vector.shape_cast %91 : vector<8x512xf32> to vector<1x8x512xf32>
    %93 = vector.broadcast %92 : vector<1x8x512xf32> to vector<4x8x512xf32>
    %94 = arith.mulf %89, %93 : vector<4x8x512xf32>
    %c1_78 = arith.constant 1 : index
    %c0_79 = arith.constant 0 : index
    %c0_80 = arith.constant 0 : index
    %95 = vector.load %arg5[%c1_78, %c0_79, %c0_80] : memref<7x8x512xf32, #tpu.memory_space<vmem>>, vector<4x8x512xf32>
    %c7 = arith.constant 7 : index
    %c0_81 = arith.constant 0 : index
    %c0_82 = arith.constant 0 : index
    %96 = vector.load %arg2[%c7, %c0_81, %c0_82] : memref<16x8x512xf32, #tpu.memory_space<vmem>>, vector<1x8x512xf32>
    %97 = vector.shape_cast %96 : vector<1x8x512xf32> to vector<8x512xf32>
    %98 = vector.shape_cast %97 : vector<8x512xf32> to vector<1x8x512xf32>
    %99 = vector.broadcast %98 : vector<1x8x512xf32> to vector<4x8x512xf32>
    %100 = arith.mulf %95, %99 : vector<4x8x512xf32>
    %101 = arith.addf %94, %100 : vector<4x8x512xf32>
    %c2_83 = arith.constant 2 : index
    %c0_84 = arith.constant 0 : index
    %c0_85 = arith.constant 0 : index
    %102 = vector.load %arg5[%c2_83, %c0_84, %c0_85] : memref<7x8x512xf32, #tpu.memory_space<vmem>>, vector<4x8x512xf32>
    %c11 = arith.constant 11 : index
    %c0_86 = arith.constant 0 : index
    %c0_87 = arith.constant 0 : index
    %103 = vector.load %arg2[%c11, %c0_86, %c0_87] : memref<16x8x512xf32, #tpu.memory_space<vmem>>, vector<1x8x512xf32>
    %104 = vector.shape_cast %103 : vector<1x8x512xf32> to vector<8x512xf32>
    %105 = vector.shape_cast %104 : vector<8x512xf32> to vector<1x8x512xf32>
    %106 = vector.broadcast %105 : vector<1x8x512xf32> to vector<4x8x512xf32>
    %107 = arith.mulf %102, %106 : vector<4x8x512xf32>
    %108 = arith.addf %101, %107 : vector<4x8x512xf32>
    %c3_88 = arith.constant 3 : index
    %c0_89 = arith.constant 0 : index
    %c0_90 = arith.constant 0 : index
    %109 = vector.load %arg5[%c3_88, %c0_89, %c0_90] : memref<7x8x512xf32, #tpu.memory_space<vmem>>, vector<4x8x512xf32>
    %c15 = arith.constant 15 : index
    %c0_91 = arith.constant 0 : index
    %c0_92 = arith.constant 0 : index
    %110 = vector.load %arg2[%c15, %c0_91, %c0_92] : memref<16x8x512xf32, #tpu.memory_space<vmem>>, vector<1x8x512xf32>
    %111 = vector.shape_cast %110 : vector<1x8x512xf32> to vector<8x512xf32>
    %112 = vector.shape_cast %111 : vector<8x512xf32> to vector<1x8x512xf32>
    %113 = vector.broadcast %112 : vector<1x8x512xf32> to vector<4x8x512xf32>
    %114 = arith.mulf %109, %113 : vector<4x8x512xf32>
    %115 = arith.addf %108, %114 : vector<4x8x512xf32>
    %cst_93 = arith.constant dense<0.000000e+00> : vector<4x8xf32>
    %116 = vector.multi_reduction <add>, %115, %cst_93 [2] : vector<4x8x512xf32> to vector<4x8xf32>
    %117 = vector.extract_strided_slice %32 {offsets = [0, 0], sizes = [4, 4], strides = [1, 1]} : vector<4x8xf32> to vector<4x4xf32>
    %118 = vector.extract_strided_slice %60 {offsets = [0, 1], sizes = [4, 4], strides = [1, 1]} : vector<4x8xf32> to vector<4x4xf32>
    %119 = arith.addf %117, %118 : vector<4x4xf32>
    %120 = vector.extract_strided_slice %88 {offsets = [0, 2], sizes = [4, 4], strides = [1, 1]} : vector<4x8xf32> to vector<4x4xf32>
    %121 = arith.addf %119, %120 : vector<4x4xf32>
    %122 = vector.extract_strided_slice %116 {offsets = [0, 3], sizes = [4, 4], strides = [1, 1]} : vector<4x8xf32> to vector<4x4xf32>
    %123 = arith.addf %121, %122 : vector<4x4xf32>
    %c0_94 = arith.constant 0 : index
    %124 = memref.load %arg3[%c0_94] : memref<1xf32, #tpu.memory_space<smem>>
    %125 = vector.broadcast %124 : f32 to vector<4x4xf32>
    %126 = arith.addf %123, %125 : vector<4x4xf32>
    %c0_95 = arith.constant 0 : index
    %c0_96 = arith.constant 0 : index
    %c0_97 = arith.constant 0 : index
    %127 = vector.load %arg4[%c0_95, %c0_96, %c0_97] : memref<1x4x4xf32, #tpu.memory_space<vmem>>, vector<1x4x4xf32>
    %128 = vector.shape_cast %127 : vector<1x4x4xf32> to vector<4x4xf32>
    %129 = vector.shape_cast %126 : vector<4x4xf32> to vector<1x4x4xf32>
    tpu.vector_store %arg4[%c0_95, %c0_96, %c0_97], %129 {strides = array<i32>} : memref<1x4x4xf32, #tpu.memory_space<vmem>>, vector<1x4x4xf32>,
    return
  }
  func.func @transform_0(%arg0: i32) -> (i32, i32, i32, i32) {
    %c0_i32 = arith.constant 0 : i32
    %c0_i32_0 = arith.constant 0 : i32
    %c0_i32_1 = arith.constant 0 : i32
    %c0_i32_2 = arith.constant 0 : i32
    return %arg0, %c0_i32, %c0_i32_0, %c0_i32_1 : i32, i32, i32, i32
  }
  func.func @transform_1(%arg0: i32) -> (i32, i32, i32) {
    %c0_i32 = arith.constant 0 : i32
    %c0_i32_0 = arith.constant 0 : i32
    %c0_i32_1 = arith.constant 0 : i32
    %c0_i32_2 = arith.constant 0 : i32
    return %c0_i32, %c0_i32_0, %c0_i32_1 : i32, i32, i32
  }
  func.func @transform_2(%arg0: i32) -> i32 {
    %c0_i32 = arith.constant 0 : i32
    %c0_i32_0 = arith.constant 0 : i32
    return %c0_i32 : i32
  }
  func.func @transform_3(%arg0: i32) -> (i32, i32, i32) {
    %c0_i32 = arith.constant 0 : i32
    %c0_i32_0 = arith.constant 0 : i32
    %c0_i32_1 = arith.constant 0 : i32
    return %arg0, %c0_i32, %c0_i32_0 : i32, i32, i32
  }
}

</mosaic_0001>

<bundles_post_ra>
// kernel: discriminator_forward.1
= control target key start
LH: loop header
LB: loop body
LE: loop exit
PB: predicated region body
PF: predicated region fallthrough
CT: control target
= control target key end

     0   :  { %s2324_s0 = inlined_call_operand.vmem [shape: f32[2,4,4,512], index: 0, kind: input, shape index: {}]   ;;  %s2325_s1 = inlined_call_operand.vmem [shape: f32[16,8,512], index: 1, kind: input, shape index: {}]   ;;  %s2326_s2 = inlined_call_operand.<no memory space> [shape: f32[1], index: 2, kind: input, shape index: {}]   ;;  %s2327_s3 = inlined_call_operand.hbm [shape: f32[2,4,4], index: 3, kind: output, shape index: {}]  }
   0x1   :  { %8 = sst [smem:[#allocation3]] %s2326_s2 }
   0x2   :  { %9 = vsyncpa [#allocation5], 0 }
   0x3   :  { %11 = vsyncpa [#allocation5 + $0x1], 0  ;;  %s1328_s14 = smov 0   ;;  %s1330_s15 = smov 0  }
   0x4   :  { %s1332_s16 = smov 0   ;;  %s1334_s17 = smov 0  }
   0x5 LB: > { %s1349_s2 = sadd.s32 4294967295, %s1300_s17   ;;  %s1114_s18 = sadd.s32 4294967294, %s1300_s17   ;;  %s1300_s17 = sphi %s1334_s17, %s2590_s17   ;;  %s1296_s16 = sphi %s1332_s16, %s2589_s16   ;;  %s1292_s15 = sphi %s1330_s15, %s2588_s15   ;;  %s1288_s14 = sphi %s1328_s14, %s2587_s14  }
   0x6   : > { %s1353_s19 = sadd.s32 1, %s1300_s17   ;;  %s92_s20 = sadd.s32 1, %s1296_s16 }
   0x7   : > { %s89_s21 = ssub.s32 %s1300_s17, %s1353_s19  ;;  %p102_p0 = scmp.ne.s32.totalorder %s1296_s16, %s1292_s15 }
   0x8   : > { %p90_p1 = scmp.eq.s32.totalorder %s89_s21, 0  ;;  %p103_p2 = scmp.eq.s32.totalorder %s1349_s2, 1 }
   0x9   : > { %p108_p3 = scmp.ne.s32.totalorder %s1292_s15, %s1288_s14  ;;  %p109_p4 = scmp.eq.s32.totalorder %s1114_s18, 1 }
   0xa   : > { %s1364_s22 = scalar_select %p90_p1, %s1296_s16, %s92_s20  }
   0xb   : > { %p1366_p5 = por %p103_p2, %p102_p0  ;;  %p1370_p6 = por %p109_p4, %p108_p3 }
   0xc   : > { %p1117_p7 = scmp.ge.s32.totalorder %s1300_s17, 1  ;;  %p141_p8 = scmp.lt.s32.totalorder %s1300_s17, 3 }
   0xe   : > { %p142_p9 = pnand %p1117_p7, %p141_p8 }
  0x10   : > { %145 = sbr.rel (%p142_p9) target bundleno = 469 (0x1d5), region = 32 }
  0x17   : > { %p165_p10 = scmp.lt.s32.totalorder %s1349_s2, 1  ;;  %v1380_v0 = vld [vmem:[%s2325_s1 + $0x20] sm:$0xff]  ;;  %v1385_v1 = vld [vmem:[%s2325_s1 + $0x28] sm:$0xff]  ;;  %v1390_v2 = vld [vmem:[%s2325_s1 + $0x30] sm:$0xff]  ;;  %v1302_v3 = vmov 0.0   ;;  %s992_s29 = sld [smem:[#allocation3]] }
  0x18   : > { %170 = vst [vmem:[#allocation2] sm:$0xff] %v1302_v3  ;;  %178 = vst [vmem:[#allocation2 + $0x40] sm:$0xff] %v1302_v3  ;;  %v1395_v4 = vld [vmem:[%s2325_s1 + $0x38] sm:$0xff]  ;;  %v1398_v5 = vmul.f32 0.0, %v1380_v0  ;;  %v1401_v6 = vmul.f32 0.0, %v1385_v1  ;;  %v1406_v7 = vld [vmem:[%s2325_s1 + $0xa0] sm:$0xff] }
  0x19   : > { %179 = vst [vmem:[#allocation2 + $0x48] sm:$0xff] %v1302_v3  ;;  %180 = vst [vmem:[#allocation2 + $0x50] sm:$0xff] %v1302_v3  ;;  %v1411_v8 = vld [vmem:[%s2325_s1 + $0xa8] sm:$0xff]  ;;  %s166_s10 = scalar_select %p165_p10, %s1349_s2, 1  ;;  %v1417_v9 = vmul.f32 0.0, %v1390_v2  ;;  %v1420_v10 = vmul.f32 0.0, %v1395_v4 }
  0x1a   : > { %181 = vst [vmem:[#allocation2 + $0x58] sm:$0xff] %v1302_v3  ;;  %182 = vst [vmem:[#allocation2 + $0x60] sm:$0xff] %v1302_v3  ;;  %v1425_v11 = vld [vmem:[%s2325_s1 + $0xb0] sm:$0xff]  ;;  %v1430_v12 = vld [vmem:[%s2325_s1 + $0xb8] sm:$0xff]  ;;  %v514_v13 = vmul.f32 0.0, %v1406_v7  ;;  %v515_v14 = vmul.f32 0.0, %v1411_v8 }
  0x1b   : > { %183 = vst [vmem:[#allocation2 + $0x68] sm:$0xff] %v1302_v3  ;;  %184 = vst [vmem:[#allocation2 + $0x70] sm:$0xff] %v1302_v3  ;;  %v516_v15 = vmul.f32 0.0, %v1425_v11  ;;  %v517_v16 = vmul.f32 0.0, %v1430_v12  ;;  %s1185_s20 = sshll.u32 %s166_s10, 6  ;;  %v1450_v19 = vld [vmem:[%s2325_s1 + $0x1a0] sm:$0xff] }
  0x1c   : > { %185 = vst [vmem:[#allocation2 + $0x78] sm:$0xff] %v1302_v3  ;;  %2443 = vst [vmem:[#allocation7_spill] sm:$0xff] %v1401_v6  ;;  %s1439_s26 = scalar_lea.vmem %s2324_s0, %s1185_s20  ;;  %v1442_v17 = vadd.f32 %v514_v13, %v1398_v5  ;;  %v1445_v18 = vadd.f32 %v515_v14, %v1401_v6  ;;  %v1455_v20 = vld [vmem:[%s2325_s1] sm:$0xff]  ;;  %v1460_v21 = vld [vmem:[%s2325_s1 + $0x8] sm:$0xff]  ;;  %v1475_v28 = vmul.f32 0.0, %v1450_v19  ;;  %s162_s30 = sand.u32 1, %s1292_s15  }
  0x1d   : > { %186 = vst [vmem:[#allocation2 + $0x80] sm:$0xff] %v1302_v3  ;;  %187 = vst [vmem:[#allocation2 + $0x88] sm:$0xff] %v1302_v3  ;;  %v198_v22 = vld [vmem:[%s1439_s26] sm:$0xff]  ;;  %v199_v23 = vld [vmem:[%s1439_s26 + $0x8] sm:$0xff]  ;;  %v1466_v25 = vadd.f32 %v516_v15, %v1417_v9  ;;  %v1469_v26 = vadd.f32 %v517_v16, %v1420_v10  ;;  %v1472_v27 = vmul.f32 0.0, %v1455_v20  ;;  %v1509_v47 = vmul.f32 0.0, %v1460_v21 }
  0x1e   : > { %188 = vst [vmem:[#allocation2 + $0x90] sm:$0xff] %v1302_v3  ;;  %189 = vst [vmem:[#allocation2 + $0x98] sm:$0xff] %v1302_v3  ;;  %v200_v24 = vld [vmem:[%s1439_s26 + $0x10] sm:$0xff]  ;;  %v201_v29 = vld [vmem:[%s1439_s26 + $0x18] sm:$0xff]  ;;  %v214_v30 = vcombine.high %v198_v22, %v198_v22  ;;  %v215_v31 = vcombine.high %v199_v23, %v199_v23  ;;  %v222_v33 = vrot.slane %v198_v22, 6  ;;  %v224_v36 = vrot.slane %v199_v23, 6 }
  0x1f   : > { %190 = vst [vmem:[#allocation2 + $0xa0] sm:$0xff] %v1302_v3  ;;  %191 = vst [vmem:[#allocation2 + $0xa8] sm:$0xff] %v1302_v3  ;;  %v216_v32 = vcombine.high %v200_v24, %v200_v24  ;;  %v1481_v34 = vld [vmem:[%s2325_s1 + $0x10] sm:$0xff]  ;;  %v217_v35 = vcombine.high %v201_v29, %v201_v29  ;;  %v226_v37 = vrot.slane %v200_v24, 6  ;;  %v228_v38 = vrot.slane %v201_v29, 6  ;;  %v1486_v39 = vld [vmem:[%s2325_s1 + $0x80] sm:$0xff] }
  0x20   : > { %192 = vst [vmem:[#allocation2 + $0xb0] sm:$0xff] %v1302_v3  ;;  %193 = vst [vmem:[#allocation2 + $0xb8] sm:$0xff] %v1302_v3  ;;  %v1491_v40 = vld [vmem:[%s2325_s1 + $0x88] sm:$0xff]  ;;  %v1496_v41 = vld [vmem:[%s2325_s1 + $0x90] sm:$0xff]  ;;  %v223_v42 = vrot.slane %v214_v30, 6  ;;  %v225_v43 = vrot.slane %v215_v31, 6 }
  0x21   : > { %2444 = vst [vmem:[#allocation8_spill] sm:$0xff] %v1417_v9  ;;  %2445 = vst [vmem:[#allocation9_spill] sm:$0xff] %v1420_v10  ;;  %v227_v44 = vrot.slane %v216_v32, 6  ;;  %v1501_v45 = vld [vmem:[%s2325_s1 + $0x1a8] sm:$0xff]  ;;  %v1506_v46 = vld [vmem:[%s2325_s1 + $0x18] sm:$0xff]  ;;  %v229_v49 = vrot.slane %v217_v35, 6 }
  0x22   : > { %2446 = vst [vmem:[#allocation10_spill] sm:$0xff] %v1455_v20  ;;  %2447 = vst [vmem:[#allocation11_spill] sm:$0xff] %v1460_v21  ;;  %v1514_v48 = vld [vmem:[%s2325_s1 + $0x98] sm:$0xff]  ;;  %v1519_v50 = vld [vmem:[%s2325_s1 + $0x1b0] sm:$0xff]  ;;  %v329_v52 = vmul.f32 0.0, %v1486_v39  ;;  %v330_v53 = vmul.f32 0.0, %v1491_v40 }
  0x23   : > { %2448 = vst [vmem:[#allocation12_spill] sm:$0xff] %v1472_v27  ;;  %2449 = vst [vmem:[#allocation13_spill] sm:$0xff] %v1481_v34  ;;  %v1524_v51 = vld [vmem:[%s2325_s1 + $0x1b8] sm:$0xff]  ;;  %v1529_v54 = vmul.f32 0.0, %v1501_v45  ;;  %v1532_v55 = vmul.f32 0.0, %v1481_v34  ;;  %v331_v56 = vmul.f32 0.0, %v1496_v41 }
  0x24   : > { %2450 = vst [vmem:[#allocation14_spill] sm:$0xff] %v1486_v39  ;;  %2451 = vst [vmem:[#allocation15_spill] sm:$0xff] %v1491_v40  ;;  %v1538_v57 = vld [vmem:[%s2325_s1 + $0x180] sm:$0xff]  ;;  %v1543_v58 = vld [vmem:[%s2325_s1 + $0x188] sm:$0xff]  ;;  %v1546_v59 = vmul.f32 0.0, %v1519_v50  ;;  %v1549_v60 = vmul.f32 0.0, %v1524_v51  ;;  %v345_v3 = vadd.f32 %v329_v52, %v1472_v27  ;;  %v346_v24 = vadd.f32 %v330_v53, %v1509_v47 }
  0x25   : > { %2452 = vst [vmem:[#allocation16_spill] sm:$0xff] %v1496_v41  ;;  %255 = vst [vmem:[#allocation2 + $0x40] sm:$0x3c] %v222_v33  ;;  %v1554_v61 = vld [vmem:[%s2325_s1 + $0x120] sm:$0xff]  ;;  %v1557_v62 = vmul.f32 0.0, %v1506_v46  ;;  %v332_v63 = vmul.f32 0.0, %v1514_v48 }
  0x26   : > { %2453 = vst [vmem:[#allocation17_spill] sm:$0xff] %v1501_v45  ;;  %2454 = vst [vmem:[#allocation18_spill] sm:$0xff] %v1506_v46  ;;  %v1564_v13 = vld [vmem:[%s2325_s1 + $0x100] sm:$0xff]  ;;  %v1574_v15 = vld [vmem:[%s2325_s1 + $0x48] sm:$0xff]  ;;  %v1582_v22 = vmul.f32 0.0, %v1538_v57  ;;  %v1612_v35 = vmul.f32 0.0, %v1543_v58 }
  0x27   : > { %2455 = vst [vmem:[#allocation19_spill] sm:$0xff] %v1509_v47  ;;  %2456 = vst [vmem:[#allocation20_spill] sm:$0xff] %v1514_v48  ;;  %v1569_v14 = vld [vmem:[%s2325_s1 + $0x40] sm:$0xff]  ;;  %v1579_v16 = vld [vmem:[%s2325_s1 + $0x50] sm:$0xff]  ;;  %v1599_v31 = vmul.f32 0.0, %v1574_v15  ;;  %s1118_s4 = sshll.u32 %s162_s30, 2 }
  0x28   : > { %257 = vst [vmem:[#allocation2 + $0x50] sm:$0x3c] %v224_v36  ;;  %259 = vst [vmem:[#allocation2 + $0x60] sm:$0x3c] %v226_v37  ;;  %v1587_v23 = vld [vmem:[%s2325_s1 + $0x130] sm:$0xff]  ;;  %v1593_v29 = vld [vmem:[%s2325_s1 + $0x58] sm:$0xff] }
  0x29   : > { %261 = vst [vmem:[#allocation2 + $0x70] sm:$0x3c] %v228_v38  ;;  %2457 = vst [vmem:[#allocation21_spill] sm:$0xff] %v1519_v50  ;;  %v1596_v30 = vmul.f32 0.0, %v1569_v14  ;;  %v1604_v32 = vld [vmem:[%s2325_s1 + $0xc0] sm:$0xff]  ;;  %v1609_v33 = vld [vmem:[%s2325_s1 + $0xc8] sm:$0xff] }
  0x2a   : > { %256 = vst [vmem:[#allocation2 + $0x48] sm:$0x3c] %v223_v42  ;;  %258 = vst [vmem:[#allocation2 + $0x58] sm:$0x3c] %v225_v43  ;;  %v1617_v36 = vld [vmem:[%s2325_s1 + $0x128] sm:$0xff]  ;;  %v1622_v37 = vld [vmem:[%s2325_s1 + $0x190] sm:$0xff] }
  0x2b   : > { %260 = vst [vmem:[#allocation2 + $0x68] sm:$0x3c] %v227_v44  ;;  %2458 = vst [vmem:[#allocation22_spill] sm:$0xff] %v1532_v55  ;;  %v1625_v38 = vmul.f32 0.0, %v1579_v16  ;;  %v1628_v42 = vmul.f32 0.0, %v1593_v29  ;;  %v1633_v43 = vld [vmem:[%s2325_s1 + $0xd0] sm:$0xff] }
  0x2c   : > { %2459 = vst [vmem:[#allocation23_spill] sm:$0xff] %v1538_v57  ;;  %2460 = vst [vmem:[#allocation24_spill] sm:$0xff] %v1543_v58  ;;  %v1638_v44 = vld [vmem:[%s2325_s1 + $0xd8] sm:$0xff]  ;;  %v667_v52 = vmul.f32 0.0, %v1609_v33  ;;  %v668_v34 = vmul.f32 0.0, %v1633_v43  ;;  %v1661_v20 = vmul.f32 0.0, %v1622_v37 }
  0x2d   : > { %2461 = vst [vmem:[#allocation25_spill] sm:$0xff] %v1549_v60  ;;  %262 = vst [vmem:[#allocation2 + $0x78] sm:$0x3c] %v229_v49  ;;  %v666_v49 = vmul.f32 0.0, %v1604_v32  ;;  %v1645_v53 = vld [vmem:[%s2325_s1 + $0x138] sm:$0xff]  ;;  %v669_v21 = vmul.f32 0.0, %v1638_v44 }
  0x2e   : > { %2462 = vst [vmem:[#allocation26_spill] sm:$0xff] %v1557_v62  ;;  %2463 = vst [vmem:[#allocation27_spill] sm:$0xff] %v1564_v13  ;;  %v1656_v46 = vld [vmem:[%s2325_s1 + $0x198] sm:$0xff]  ;;  %v684_v41 = vadd.f32 %v668_v34, %v1625_v38  ;;  %vm1032_vm0 = vcmask 1041409   ;;  %vm1034_vm1 = vcmask 1042434   ;;  %s1182_s5 = sshll.u32 %s1349_s2, 6 }
  0x2f   : > { %2464 = vst [vmem:[#allocation28_spill] sm:$0xff] %v1569_v14  ;;  %2465 = vst [vmem:[#allocation29_spill] sm:$0xff] %v1574_v15  ;;  %v1674_v15 = vld [vmem:[%s2325_s1 + $0x118] sm:$0xff]  ;;  %v682_v14 = vadd.f32 %v666_v49, %v1596_v30  ;;  %v1681_v47 = vld [vmem:[#allocation2 + $0x50] sm:$0xff]  ;;  %v685_v49 = vadd.f32 %v669_v21, %v1628_v42  ;;  %s164_s6 = scalar_lea.vmem [#allocation4], %s1118_s4  ;;  %vm1036_vm2 = vcmask 1043459   ;;  %s2282_s9 = scalar_lea.hbm %s2327_s3, %s1182_s5 }
  0x30   : > { %2466 = vst [vmem:[#allocation30_spill] sm:$0xff] %v1579_v16  ;;  %2467 = vst [vmem:[#allocation31_spill] sm:$0xff] %v1582_v22  ;;  %v1651_v22 = vld [vmem:[%s2325_s1 + $0x110] sm:$0xff]  ;;  %v1669_v16 = vld [vmem:[%s2325_s1 + $0x108] sm:$0xff]  ;;  %v553_v39 = vmul.f32 %v1587_v23, %v1681_v47  ;;  %s1055_s7 = sshll.u32 %s164_s6, 4  ;;  %vm1039_vm3 = vcmask 27648   ;;  %s2284_s7 = int_to_ptr.vmem [resolvable:$true] %s1055_s7 }
  0x31   : > { %2468 = vst [vmem:[#allocation32_spill] sm:$0xff] %v1593_v29  ;;  %2469 = vst [vmem:[#allocation33_spill] sm:$0xff] %v1596_v30  ;;  %v1663_v29 = vld [vmem:[#allocation2 + $0x40] sm:$0xff]  ;;  %v1695_v40 = vld [vmem:[#allocation2 + $0x58] sm:$0xff]  ;;  %v384_v34 = vmul.f32 %v1651_v22, %v1681_v47  ;;  %s1042_s2 = scalar_lea.sflag [#allocation5], %s162_s30  ;;  %s1238_s10 = scalar_lea.vmem %s2284_s7, 64 }
  0x32   : > { %2470 = vst [vmem:[#allocation34_spill] sm:$0xff] %v1599_v31  ;;  %2471 = vst [vmem:[#allocation35_spill] sm:$0xff] %v1604_v32  ;;  %v551_v27 = vmul.f32 %v1554_v61, %v1663_v29  ;;  %v382_v48 = vmul.f32 %v1564_v13, %v1663_v29  ;;  %v385_v32 = vmul.f32 %v1674_v15, %v1695_v40  ;;  %p1239_p11 = scmp.ne.s32.totalorder %s2284_s7, %s1238_s10  ;;  %s1304_s11 = smov [#allocation4]  }
  0x33   : > { %2472 = vst [vmem:[#allocation36_spill] sm:$0xff] %v1609_v33  ;;  %2473 = vst [vmem:[#allocation37_spill] sm:$0xff] %v1612_v35  ;;  %v347_v35 = vadd.f32 %v331_v56, %v1532_v55  ;;  %v348_v56 = vadd.f32 %v332_v63, %v1557_v62  ;;  %v683_v55 = vadd.f32 %v667_v52, %v1599_v31  ;;  %v1683_v63 = vld [vmem:[#allocation2 + $0x60] sm:$0xff]  ;;  %v1685_v62 = vld [vmem:[#allocation2 + $0x70] sm:$0xff]  ;;  %s1242_s12 = sshll.u32 %s1304_s11, 4  ;;  %s1243_s12 = int_to_ptr.vmem [resolvable:$false] %s1242_s12 }
  0x34   : > { %2474 = vst [vmem:[#allocation38_spill] sm:$0xff] %v1622_v37  ;;  %2475 = vst [vmem:[#allocation39_spill] sm:$0xff] %v1625_v38  ;;  %v1693_v52 = vld [vmem:[#allocation2 + $0x48] sm:$0xff]  ;;  %v588_v31 = vmul.f32 %v1450_v19, %v1683_v63  ;;  %v590_v30 = vmul.f32 %v1519_v50, %v1685_v62  ;;  %v1707_v13 = vld [vmem:[#allocation2 + $0x78] sm:$0xff]  ;;  %v567_v38 = vadd.f32 %v551_v27, %v1442_v17  ;;  %p1240_p12 = pnand %p1239_p11, %p1366_p5  ;;  %s1244_s13 = scalar_lea.vmem %s1243_s12, 128 }
  0x35   : > { %2476 = vst [vmem:[#allocation40_spill] sm:$0xff] %v1628_v42  ;;  %2477 = vst [vmem:[#allocation41_spill] sm:$0xff] %v1633_v43  ;;  %v552_v21 = vmul.f32 %v1617_v36, %v1693_v52  ;;  %v554_v42 = vmul.f32 %v1645_v53, %v1695_v40  ;;  %v569_v43 = vadd.f32 %v553_v39, %v1466_v25  ;;  %v1728_v27 = vld [vmem:[%s2325_s1 + $0x140] sm:$0xff]  ;;  %v1733_v25 = vld [vmem:[%s2325_s1 + $0x148] sm:$0xff]  ;;  %p1245_p0 = scmp.lt.s32.totalorder %s2284_s7, %s1243_s12  ;;  %p1246_p1 = scmp.lt.s32.totalorder %s1244_s13, %s1238_s10 }
  0x36   : > { %2478 = vst [vmem:[#allocation42_spill] sm:$0xff] %v1638_v44  ;;  %2479 = vst [vmem:[#allocation43_spill] sm:$0xff] %v1651_v22  ;;  %v591_v33 = vmul.f32 %v1524_v51, %v1707_v13  ;;  %v383_v22 = vmul.f32 %v1669_v16, %v1693_v52  ;;  %v604_v6 = vadd.f32 %v588_v31, %v567_v38  ;;  %p1241_p13 = pneg %p1240_p12 }
  0x37   : > { %2480 = vst [vmem:[#allocation44_spill] sm:$0xff] %v1656_v46  ;;  %2481 = vst [vmem:[#allocation45_spill] sm:$0xff] %v1661_v20  ;;  %v1679_v20 = vmul.f32 0.0, %v1656_v46  ;;  %v568_v10 = vadd.f32 %v552_v21, %v1445_v18  ;;  %v570_v9 = vadd.f32 %v554_v42, %v1469_v26  ;;  %v398_v17 = vadd.f32 %v382_v48, %v345_v3  ;;  %v1738_v18 = vld [vmem:[%s2325_s1 + $0x150] sm:$0xff]  ;;  %v1762_v42 = vld [vmem:[%s2325_s1 + $0x1c0] sm:$0xff]  ;;  %p1247_p2 = por %p1246_p1, %p1245_p0 }
  0x38   : > { %2482 = vst [vmem:[#allocation46_spill] sm:$0xff] %v1669_v16  ;;  %2483 = vst [vmem:[#allocation47_spill] sm:$0xff] %v1674_v15  ;;  %v606_v39 = vadd.f32 %v590_v30, %v569_v43  ;;  %v399_v16 = vadd.f32 %v383_v22, %v346_v24  ;;  %v400_v60 = vadd.f32 %v384_v34, %v347_v35  ;;  %v1747_v30 = vld [vmem:[%s2325_s1 + $0x158] sm:$0xff]  ;;  %v1767_v43 = vld [vmem:[%s2325_s1 + $0x1c8] sm:$0xff] }
  0x39   : > { %2484 = vst [vmem:[#allocation48_spill] sm:$0xff] %v1679_v20  ;;  %v1697_v20 = vld [vmem:[#allocation2 + $0x68] sm:$0xff]  ;;  %2485 = vst [vmem:[#allocation49_spill] sm:$0xff] %v1728_v27  ;;  %v401_v15 = vadd.f32 %v385_v32, %v348_v56  ;;  %v607_v48 = vadd.f32 %v591_v33, %v570_v9  ;;  %v436_v3 = vmul.f32 %v1538_v57, %v1683_v63  ;;  %v1779_v21 = vld [vmem:[%s2325_s1 + $0x1d8] sm:$0xff]  ;;  %p1248_p3 = pnand %p1247_p2, %p1241_p13 }
  0x3a   : > { %v589_v44 = vmul.f32 %v1501_v45, %v1697_v20  ;;  %2486 = vst [vmem:[#allocation50_spill] sm:$0xff] %v1733_v25  ;;  %2487 = vst [vmem:[#allocation51_spill] sm:$0xff] %v1738_v18  ;;  %v437_v31 = vmul.f32 %v1543_v58, %v1697_v20  ;;  %v438_v22 = vmul.f32 %v1622_v37, %v1685_v62  ;;  %v203_v37 = vld [vmem:[%s1439_s26 + $0x28] sm:$0xff] }
  0x3b   : > { %2488 = vst [vmem:[#allocation52_spill] sm:$0xff] %v1747_v30  ;;  %v439_v24 = vmul.f32 %v1656_v46, %v1707_v13  ;;  %v703_v9 = vmul.f32 %v1728_v27, %v1663_v29  ;;  %v452_v33 = vadd.f32 %v436_v3, %v398_v17  ;;  %v705_v38 = vmul.f32 %v1738_v18, %v1681_v47  ;;  %v202_v17 = vld [vmem:[%s1439_s26 + $0x20] sm:$0xff] }
  0x3c   : > { %v605_v26 = vadd.f32 %v589_v44, %v568_v10  ;;  %v704_v10 = vmul.f32 %v1733_v25, %v1693_v52  ;;  %v453_v35 = vadd.f32 %v437_v31, %v399_v16  ;;  %2489 = vst [vmem:[#allocation53_spill] sm:$0xff] %v1762_v42  ;;  %2490 = vst [vmem:[#allocation54_spill] sm:$0xff] %v1767_v43 }
  0x3d   : > { %v454_v16 = vadd.f32 %v438_v22, %v400_v60  ;;  %v455_v44 = vadd.f32 %v439_v24, %v401_v15  ;;  %v706_v56 = vmul.f32 %v1747_v30, %v1695_v40  ;;  %v719_v34 = vadd.f32 %v703_v9, %v682_v14  ;;  %2492 = vst [vmem:[#allocation56_spill] sm:$0xff] %v1779_v21  ;;  %v204_v22 = vld [vmem:[%s1439_s26 + $0x30] sm:$0xff]  ;;  %v205_v24 = vld [vmem:[%s1439_s26 + $0x38] sm:$0xff] }
  0x3e   : > { %v620_v32 = vadd.f32 %v605_v26, %v604_v6  ;;  %v1772_v6 = vld [vmem:[%s2325_s1 + $0x1d0] sm:$0xff]  ;;  %v468_v3 = vadd.f32 %v453_v35, %v452_v33  ;;  %v720_v31 = vadd.f32 %v704_v10, %v683_v55  ;;  %v721_v46 = vadd.f32 %v705_v38, %v684_v41 }
  0x3f   : > { %2491 = vst [vmem:[#allocation55_spill] sm:$0xff] %v1772_v6  ;;  %v722_v58 = vadd.f32 %v706_v56, %v685_v49  ;;  %v740_v60 = vmul.f32 %v1762_v42, %v1683_v63  ;;  %v741_v15 = vmul.f32 %v1767_v43, %v1697_v20  ;;  %v742_v14 = vmul.f32 %v1772_v6, %v1685_v62 }
  0x40   : > { %v621_v26 = vadd.f32 %v620_v32, %v606_v39  ;;  %v469_v57 = vadd.f32 %v468_v3, %v454_v16  ;;  %v743_v39 = vmul.f32 %v1779_v21, %v1707_v13  ;;  %v218_v55 = vcombine.high %v202_v17, %v202_v17  ;;  %v1942_v21 = vld [vmem:[%s2325_s1 + $0x1f0] sm:$0xff] }
  0x41   : > { %v756_v41 = vadd.f32 %v740_v60, %v719_v34  ;;  %v757_v10 = vadd.f32 %v741_v15, %v720_v31  ;;  %v758_v49 = vadd.f32 %v742_v14, %v721_v46  ;;  %v219_v32 = vcombine.high %v203_v37, %v203_v37  ;;  %v1796_v34 = vld [vmem:[%s2325_s1 + $0x60] sm:$0xff]  ;;  %v1833_v15 = vld [vmem:[%s2325_s1 + $0xe8] sm:$0xff]  ;;  %2511 = vst [vmem:[#allocation75_spill] sm:$0xff] %v1942_v21 }
  0x42   : > { %v622_v9 = vadd.f32 %v621_v26, %v607_v48  ;;  %v470_v33 = vadd.f32 %v469_v57, %v455_v44  ;;  %v759_v35 = vadd.f32 %v743_v39, %v722_v58  ;;  %v220_v38 = vcombine.high %v204_v22, %v204_v22  ;;  %2493 = vst [vmem:[#allocation57_spill] sm:$0xff] %v1796_v34  ;;  %v1810_v44 = vld [vmem:[%s2325_s1 + $0x70] sm:$0xff]  ;;  %v1828_v60 = vld [vmem:[%s2325_s1 + $0xe0] sm:$0xff] }
  0x43   : > { %v221_v56 = vcombine.high %v205_v24, %v205_v24  ;;  %v772_v43 = vadd.f32 %v757_v10, %v756_v41  ;;  %v230_v42 = vrot.slane %v202_v17, 6  ;;  %v231_v6 = vrot.slane %v218_v55, 6  ;;  %2495 = vst [vmem:[#allocation59_spill] sm:$0xff] %v1810_v44  ;;  %v1823_v17 = vld [vmem:[%s2325_s1 + $0x78] sm:$0xff]  ;;  %2497 = vst [vmem:[#allocation61_spill] sm:$0xff] %v1828_v60  ;;  %v1845_v39 = vld [vmem:[%s2325_s1 + $0xf0] sm:$0xff] }
  0x44   : > { %623 = vadd.xlane.f32.xlu0 %v622_v9  ;;  %v232_v30 = vrot.slane %v203_v37, 6  ;;  %471 = vadd.xlane.f32.xlu1 %v470_v33  ;;  %v233_v48 = vrot.slane %v219_v32, 6  ;;  %v234_v16 = vrot.slane %v204_v22, 6  ;;  %v235_v26 = vrot.slane %v220_v38, 6  ;;  %v1805_v37 = vld [vmem:[%s2325_s1 + $0x68] sm:$0xff]  ;;  %2496 = vst [vmem:[#allocation60_spill] sm:$0xff] %v1823_v17 }
  0x45   : > { %v236_v3 = vrot.slane %v205_v24, 6  ;;  %v773_v46 = vadd.f32 %v772_v43, %v758_v49  ;;  %v237_v31 = vrot.slane %v221_v56, 6  ;;  %263 = vst [vmem:[#allocation2 + $0x80] sm:$0x3c] %v230_v42  ;;  %264 = vst [vmem:[#allocation2 + $0x88] sm:$0x3c] %v231_v6  ;;  %v501_v57 = vmul.f32 %v1380_v0, %v1663_v29 }
  0x46   : > { %265 = vst [vmem:[#allocation2 + $0x90] sm:$0x3c] %v232_v30  ;;  %v502_v58 = vmul.f32 %v1385_v1, %v1693_v52  ;;  %2494 = vst [vmem:[#allocation58_spill] sm:$0xff] %v1805_v37  ;;  %v503_v30 = vmul.f32 %v1390_v2, %v1681_v47  ;;  %v504_v42 = vmul.f32 %v1395_v4, %v1695_v40  ;;  %v1840_v9 = vmul.f32 0.0, %v1796_v34  ;;  %v1850_v55 = vld [vmem:[%s2325_s1 + $0xf8] sm:$0xff]  ;;  %v1855_v41 = vld [vmem:[%s2325_s1 + $0x160] sm:$0xff] }
  0x47   : > { %266 = vst [vmem:[#allocation2 + $0x98] sm:$0x3c] %v233_v48  ;;  %267 = vst [vmem:[#allocation2 + $0xa0] sm:$0x3c] %v234_v16  ;;  %v522_v43 = vmul.f32 %v1406_v7, %v1683_v63  ;;  %v523_v6 = vmul.f32 %v1411_v8, %v1697_v20  ;;  %v774_v14 = vadd.f32 %v773_v46, %v759_v35  ;;  %v1858_v32 = vmul.f32 0.0, %v1805_v37  ;;  %v1866_v35 = vld [vmem:[%s2325_s1 + $0x168] sm:$0xff] }
  0x48   : > { %268 = vst [vmem:[#allocation2 + $0xa8] sm:$0x3c] %v235_v26  ;;  %269 = vst [vmem:[#allocation2 + $0xb0] sm:$0x3c] %v236_v3  ;;  %v524_v22 = vmul.f32 %v1425_v11, %v1685_v62  ;;  %v525_v24 = vmul.f32 %v1430_v12, %v1707_v13  ;;  %v1861_v33 = vmul.f32 0.0, %v1810_v44  ;;  %v1871_v38 = vld [vmem:[%s2325_s1 + $0x170] sm:$0xff]  ;;  %v894_v27 = vmul.f32 %v1942_v21, %v1685_v62 }
  0x49   : > { %2498 = vst [vmem:[#allocation62_spill] sm:$0xff] %v1833_v15  ;;  %270 = vst [vmem:[#allocation2 + $0xb8] sm:$0x3c] %v237_v31  ;;  %v538_v10 = vadd.f32 %v522_v43, %v501_v57  ;;  %v539_v49 = vadd.f32 %v523_v6, %v502_v58  ;;  %v1876_v56 = vld [vmem:[%s2325_s1 + $0x178] sm:$0xff]  ;;  %775 = vadd.xlane.f32.xlu0 %v774_v14  ;;  %v1879_v26 = vmul.f32 0.0, %v1823_v17  ;;  %v818_v3 = vmul.f32 0.0, %v1828_v60 }
  0x4a   : > { %2499 = vst [vmem:[#allocation63_spill] sm:$0xff] %v1840_v9  ;;  %2500 = vst [vmem:[#allocation64_spill] sm:$0xff] %v1845_v39  ;;  %v540_v48 = vadd.f32 %v524_v22, %v503_v30  ;;  %v541_v16 = vadd.f32 %v525_v24, %v504_v42  ;;  %v1885_v46 = vld [vmem:[%s2325_s1 + $0x1e0] sm:$0xff]  ;;  %v819_v31 = vmul.f32 0.0, %v1833_v15  ;;  %v820_v57 = vmul.f32 0.0, %v1845_v39  ;;  %v1935_v39 = vld [vmem:[%s2325_s1 + $0x1e8] sm:$0xff] }
  0x4b   : > { %2501 = vst [vmem:[#allocation65_spill] sm:$0xff] %v1850_v55  ;;  %2502 = vst [vmem:[#allocation66_spill] sm:$0xff] %v1855_v41  ;;  %v821_v58 = vmul.f32 0.0, %v1850_v55  ;;  %v855_v30 = vmul.f32 %v1855_v41, %v1663_v29  ;;  %v834_v42 = vadd.f32 %v818_v3, %v1840_v9  ;;  %v856_v43 = vmul.f32 %v1866_v35, %v1693_v52 }
  0x4c   : > { %2503 = vst [vmem:[#allocation67_spill] sm:$0xff] %v1858_v32  ;;  %2504 = vst [vmem:[#allocation68_spill] sm:$0xff] %v1861_v33  ;;  %v857_v6 = vmul.f32 %v1871_v38, %v1681_v47  ;;  %v858_v14 = vmul.f32 %v1876_v56, %v1695_v40  ;;  %v1899_v22 = vld [vmem:[#allocation2 + $0x80] sm:$0xff]  ;;  %v1901_v24 = vld [vmem:[#allocation2 + $0x88] sm:$0xff]  ;;  %v835_v44 = vadd.f32 %v819_v31, %v1858_v32 }
  0x4d   : > { %2505 = vst [vmem:[#allocation69_spill] sm:$0xff] %v1866_v35  ;;  %2506 = vst [vmem:[#allocation70_spill] sm:$0xff] %v1871_v38  ;;  %v1903_v17 = vld [vmem:[#allocation2 + $0x90] sm:$0xff]  ;;  %v836_v37 = vadd.f32 %v820_v57, %v1861_v33  ;;  %v837_v3 = vadd.f32 %v821_v58, %v1879_v26  ;;  %v892_v34 = vmul.f32 %v1885_v46, %v1683_v63 }
  0x4e   : > { %2507 = vst [vmem:[#allocation71_spill] sm:$0xff] %v1876_v56  ;;  %2508 = vst [vmem:[#allocation72_spill] sm:$0xff] %v1879_v26  ;;  %v1910_v35 = vld [vmem:[#allocation2 + $0x98] sm:$0xff]  ;;  %v1912_v38 = vld [vmem:[#allocation2 + $0xa0] sm:$0xff]  ;;  %v559_v41 = vmul.f32 %v1554_v61, %v1899_v22  ;;  %v560_v9 = vmul.f32 %v1617_v36, %v1901_v24  ;;  %v561_v31 = vmul.f32 %v1587_v23, %v1903_v17 }
  0x4f   : > { %2509 = vst [vmem:[#allocation73_spill] sm:$0xff] %v1885_v46  ;;  %v1914_v56 = vld [vmem:[#allocation2 + $0xa8] sm:$0xff]  ;;  %v871_v57 = vadd.f32 %v855_v30, %v834_v42  ;;  %v1922_v58 = vld [vmem:[#allocation2 + $0xb0] sm:$0xff]  ;;  %v562_v46 = vmul.f32 %v1645_v53, %v1910_v35  ;;  %v596_v33 = vmul.f32 %v1450_v19, %v1912_v38  ;;  %v872_v55 = vadd.f32 %v856_v43, %v835_v44  ;;  %v1947_v44 = vld [vmem:[%s2325_s1 + $0x1f8] sm:$0xff] }
  0x50   : > { %v1924_v26 = vld [vmem:[#allocation2 + $0xb8] sm:$0xff]  ;;  %v597_v32 = vmul.f32 %v1501_v45, %v1914_v56  ;;  %2510 = vst [vmem:[#allocation74_spill] sm:$0xff] %v1935_v39  ;;  %v575_v30 = vadd.f32 %v559_v41, %v538_v10  ;;  %v576_v42 = vadd.f32 %v560_v9, %v539_v49  ;;  %v577_v15 = vadd.f32 %v561_v31, %v540_v48 }
  0x51   : > { %v598_v60 = vmul.f32 %v1519_v50, %v1922_v58  ;;  %2512 = vst [vmem:[#allocation76_spill] sm:$0xff] %v1947_v44  ;;  %v578_v43 = vadd.f32 %v562_v46, %v541_v16  ;;  %v599_v18 = vmul.f32 %v1524_v51, %v1924_v26  ;;  %v873_v41 = vadd.f32 %v857_v6, %v836_v37 }
  0x52   : > { %v874_v9 = vadd.f32 %v858_v14, %v837_v3  ;;  %v612_v10 = vadd.f32 %v596_v33, %v575_v30  ;;  %v613_v49 = vadd.f32 %v597_v32, %v576_v42  ;;  %v893_v31 = vmul.f32 %v1935_v39, %v1697_v20 }
  0x53   : > { %v614_v48 = vadd.f32 %v598_v60, %v577_v15  ;;  %v615_v25 = vadd.f32 %v599_v18, %v578_v43  ;;  %v895_v50 = vmul.f32 %v1947_v44, %v1707_v13  ;;  %v908_v45 = vadd.f32 %v892_v34, %v871_v57 }
  0x54   : > { %v630_v16 = vadd.f32 %v613_v49, %v612_v10  ;;  %v909_v46 = vadd.f32 %v893_v31, %v872_v55  ;;  %v505_v37 = vmul.f32 %v1380_v0, %v1683_v63  ;;  %v506_v32 = vmul.f32 %v1385_v1, %v1697_v20 }
  0x55   : > { %v910_v60 = vadd.f32 %v894_v27, %v873_v41  ;;  %v911_v15 = vadd.f32 %v895_v50, %v874_v9  ;;  %v507_v18 = vmul.f32 %v1390_v2, %v1685_v62  ;;  %v508_v33 = vmul.f32 %v1395_v4, %v1707_v13 }
  0x56   : > { %v631_v6 = vadd.f32 %v630_v16, %v614_v48  ;;  %v924_v14 = vadd.f32 %v909_v46, %v908_v45  ;;  %v526_v34 = vmul.f32 %v1406_v7, %v1899_v22  ;;  %v527_v55 = vmul.f32 %v1411_v8, %v1901_v24 }
  0x57   : > { %v528_v0 = vmul.f32 %v1425_v11, %v1903_v17  ;;  %v529_v1 = vmul.f32 %v1430_v12, %v1910_v35  ;;  %v563_v2 = vmul.f32 %v1554_v61, %v1912_v38  ;;  %v564_v4 = vmul.f32 %v1617_v36, %v1914_v56 }
  0x58   : > { %v632_v50 = vadd.f32 %v631_v6, %v615_v25  ;;  %v925_v45 = vadd.f32 %v924_v14, %v910_v60  ;;  %v542_v27 = vadd.f32 %v526_v34, %v505_v37  ;;  %v543_v3 = vadd.f32 %v527_v55, %v506_v32 }
  0x59   : > { %v544_v57 = vadd.f32 %v528_v0, %v507_v18  ;;  %v545_v30 = vadd.f32 %v529_v1, %v508_v33  ;;  %v565_v42 = vmul.f32 %v1587_v23, %v1922_v58  ;;  %v566_v43 = vmul.f32 %v1645_v53, %v1924_v26  ;;  %v2514_v33 = vld [vmem:[#allocation7_spill] sm:$0xff]  ;;  %v2517_v0 = vld [vmem:[#allocation17_spill] sm:$0xff] }
  0x5a   : > { %633 = vadd.xlane.f32.xlu1 %v632_v50  ;;  %v926_v41 = vadd.f32 %v925_v45, %v911_v15  ;;  %v579_v9 = vadd.f32 %v563_v2, %v542_v27  ;;  %v580_v10 = vadd.f32 %v564_v4, %v543_v3  ;;  %v518_v49 = vmul.f32 %v1406_v7, %v1663_v29  ;;  %v2513_v15 = vld [vmem:[#allocation25_spill] sm:$0xff]  ;;  %v2519_v3 = vld [vmem:[#allocation35_spill] sm:$0xff] }
  0x5b   : > { %v581_v48 = vadd.f32 %v565_v42, %v544_v57  ;;  %v582_v25 = vadd.f32 %v566_v43, %v545_v30  ;;  %v519_v31 = vmul.f32 %v1411_v8, %v1693_v52  ;;  %v520_v16 = vmul.f32 %v1425_v11, %v1681_v47  ;;  %v2515_v8 = vld [vmem:[#allocation8_spill] sm:$0xff]  ;;  %v2516_v11 = vld [vmem:[#allocation9_spill] sm:$0xff] }
  0x5c   : > { %927 = vadd.xlane.f32.xlu0 %v926_v41  ;;  %v616_v46 = vadd.f32 %v1475_v28, %v579_v9  ;;  %v617_v37 = vadd.f32 %v1529_v54, %v580_v10  ;;  %v521_v32 = vmul.f32 %v1430_v12, %v1695_v40  ;;  %v534_v60 = vadd.f32 %v518_v49, %v1398_v5  ;;  %v2520_v42 = vld [vmem:[#allocation36_spill] sm:$0xff]  ;;  %v2521_v10 = vld [vmem:[#allocation41_spill] sm:$0xff] }
  0x5d   : > { %v618_v7 = vadd.f32 %v1546_v59, %v581_v48  ;;  %v619_v18 = vadd.f32 %v2513_v15, %v582_v25  ;;  %v535_v6 = vadd.f32 %v519_v31, %v2514_v33  ;;  %v536_v14 = vadd.f32 %v520_v16, %v2515_v8  ;;  %v2522_v48 = vld [vmem:[#allocation42_spill] sm:$0xff] }
  0x5e   : > { %v635_v34 = vadd.f32 %v617_v37, %v616_v46  ;;  %v537_v55 = vadd.f32 %v521_v32, %v2516_v11  ;;  %v555_v28 = vmul.f32 %v1554_v61, %v1683_v63  ;;  %v556_v54 = vmul.f32 %v1617_v36, %v1697_v20  ;;  %v2518_v61 = vld [vmem:[#allocation21_spill] sm:$0xff]  ;;  %v2524_v46 = vld [vmem:[#allocation34_spill] sm:$0xff] }
  0x5f   : > { %v557_v5 = vmul.f32 %v1587_v23, %v1685_v62  ;;  %v558_v12 = vmul.f32 %v1645_v53, %v1707_v13  ;;  %v592_v59 = vmul.f32 %v1450_v19, %v1899_v22  ;;  %v593_v1 = vmul.f32 %v2517_v0, %v1901_v24  ;;  %v2525_v32 = vld [vmem:[#allocation49_spill] sm:$0xff] }
  0x60   : > { %v636_v2 = vadd.f32 %v635_v34, %v618_v7  ;;  %v571_v4 = vadd.f32 %v555_v28, %v534_v60  ;;  %v572_v50 = vadd.f32 %v556_v54, %v535_v6  ;;  %v594_v45 = vmul.f32 %v2518_v61, %v1903_v17  ;;  %v2526_v7 = vld [vmem:[#allocation39_spill] sm:$0xff]  ;;  %v2528_v6 = vld [vmem:[#allocation50_spill] sm:$0xff] }
  0x61   : > { %v573_v27 = vadd.f32 %v557_v5, %v536_v14  ;;  %v574_v36 = vadd.f32 %v558_v12, %v537_v55  ;;  %v595_v23 = vmul.f32 %v1524_v51, %v1910_v35  ;;  %v670_v53 = vmul.f32 %v2519_v3, %v1663_v29  ;;  %v2523_v51 = vld [vmem:[#allocation33_spill] sm:$0xff]  ;;  %v2529_v14 = vld [vmem:[#allocation51_spill] sm:$0xff]  ;;  %v2530_v55 = vld [vmem:[#allocation52_spill] sm:$0xff] }
  0x62   : > { %v637_v57 = vadd.f32 %v636_v2, %v619_v18  ;;  %v608_v30 = vadd.f32 %v592_v59, %v571_v4  ;;  %v609_v19 = vadd.f32 %v593_v1, %v572_v50  ;;  %v671_v43 = vmul.f32 %v2520_v42, %v1693_v52  ;;  %v2527_v18 = vld [vmem:[#allocation40_spill] sm:$0xff]  ;;  %v2531_v5 = vld [vmem:[#allocation53_spill] sm:$0xff]  ;;  %v2532_v1 = vld [vmem:[#allocation54_spill] sm:$0xff] }
  0x63   : > { %v610_v41 = vadd.f32 %v594_v45, %v573_v27  ;;  %v611_v9 = vadd.f32 %v595_v23, %v574_v36  ;;  %v672_v49 = vmul.f32 %v2521_v10, %v1681_v47  ;;  %v673_v25 = vmul.f32 %v2522_v48, %v1695_v40  ;;  %v2533_v4 = vld [vmem:[#allocation55_spill] sm:$0xff]  ;;  %v2534_v27 = vld [vmem:[#allocation56_spill] sm:$0xff] }
  0x64   : > { %638 = vadd.xlane.f32.xlu1 %v637_v57  ;;  %v625_v31 = vadd.f32 %v609_v19, %v608_v30  ;;  %v686_v16 = vadd.f32 %v670_v53, %v2523_v51  ;;  %v687_v37 = vadd.f32 %v671_v43, %v2524_v46  ;;  %v707_v60 = vmul.f32 %v2525_v32, %v1683_v63  ;;  %v2535_v30 = vld [vmem:[#allocation14_spill] sm:$0xff]  ;;  %v2536_v43 = vld [vmem:[#allocation15_spill] sm:$0xff] }
  0x65   : > { %v688_v15 = vadd.f32 %v672_v49, %v2526_v7  ;;  %v689_v33 = vadd.f32 %v673_v25, %v2527_v18  ;;  %v708_v8 = vmul.f32 %v2528_v6, %v1697_v20  ;;  %v709_v34 = vmul.f32 %v2529_v14, %v1685_v62  ;;  %v2537_v25 = vld [vmem:[#allocation16_spill] sm:$0xff] }
  0x66   : > { %v626_v11 = vadd.f32 %v625_v31, %v610_v41  ;;  %v710_v28 = vmul.f32 %v2530_v55, %v1707_v13  ;;  %v723_v54 = vadd.f32 %v707_v60, %v686_v16  ;;  %v744_v12 = vmul.f32 %v2531_v5, %v1899_v22  ;;  %v2539_v16 = vld [vmem:[#allocation27_spill] sm:$0xff]  ;;  %v2540_v60 = vld [vmem:[#allocation12_spill] sm:$0xff] }
  0x67   : > { %v724_v59 = vadd.f32 %v708_v8, %v687_v37  ;;  %v725_v0 = vadd.f32 %v709_v34, %v688_v15  ;;  %v745_v2 = vmul.f32 %v2532_v1, %v1901_v24  ;;  %v746_v50 = vmul.f32 %v2533_v4, %v1903_v17  ;;  %v2541_v15 = vld [vmem:[#allocation19_spill] sm:$0xff]  ;;  %v2543_v34 = vld [vmem:[#allocation22_spill] sm:$0xff] }
  0x68   : > { %v627_v61 = vadd.f32 %v626_v11, %v611_v9  ;;  %v726_v45 = vadd.f32 %v710_v28, %v689_v33  ;;  %v747_v36 = vmul.f32 %v2534_v27, %v1910_v35  ;;  %v760_v23 = vadd.f32 %v744_v12, %v723_v54  ;;  %v2538_v9 = vld [vmem:[#allocation20_spill] sm:$0xff]  ;;  %v2542_v33 = vld [vmem:[#allocation46_spill] sm:$0xff]  ;;  %v2545_v12 = vld [vmem:[#allocation43_spill] sm:$0xff] }
  0x69   : > { %v761_v53 = vadd.f32 %v745_v2, %v724_v59  ;;  %v762_v57 = vadd.f32 %v746_v50, %v725_v0  ;;  %v333_v19 = vmul.f32 %v2535_v30, %v1663_v29  ;;  %v334_v41 = vmul.f32 %v2536_v43, %v1693_v52  ;;  %v2544_v28 = vld [vmem:[#allocation26_spill] sm:$0xff]  ;;  %v2546_v0 = vld [vmem:[#allocation47_spill] sm:$0xff] }
  0x6a   : > { %628 = vadd.xlane.f32.xlu0 %v627_v61  ;;  %v763_v49 = vadd.f32 %v747_v36, %v726_v45  ;;  %v335_v31 = vmul.f32 %v2537_v25, %v1681_v47  ;;  %v336_v51 = vmul.f32 %v2538_v9, %v1695_v40  ;;  %v386_v46 = vmul.f32 %v2539_v16, %v1683_v63  ;;  %v2547_v36 = vld [vmem:[#allocation23_spill] sm:$0xff] }
  0x6b   : > { %v777_v37 = vadd.f32 %v761_v53, %v760_v23  ;;  %v349_v7 = vadd.f32 %v333_v19, %v2540_v60  ;;  %v350_v18 = vadd.f32 %v334_v41, %v2541_v15  ;;  %v387_v8 = vmul.f32 %v2542_v33, %v1697_v20  ;;  %v2548_v41 = vld [vmem:[#allocation24_spill] sm:$0xff] }
  0x6c   : > { %v351_v11 = vadd.f32 %v335_v31, %v2543_v34  ;;  %v352_v54 = vadd.f32 %v336_v51, %v2544_v28  ;;  %v388_v59 = vmul.f32 %v2545_v12, %v1685_v62  ;;  %v389_v2 = vmul.f32 %v2546_v0, %v1707_v13  ;;  %v2549_v31 = vld [vmem:[#allocation38_spill] sm:$0xff]  ;;  %v2550_v34 = vld [vmem:[#allocation44_spill] sm:$0xff] }
  0x6d   : > { %v778_v50 = vadd.f32 %v777_v37, %v762_v57  ;;  %v402_v61 = vadd.f32 %v386_v46, %v349_v7  ;;  %v403_v45 = vadd.f32 %v387_v8, %v350_v18  ;;  %v440_v23 = vmul.f32 %v2547_v36, %v1899_v22  ;;  %v2551_v57 = vld [vmem:[#allocation28_spill] sm:$0xff]  ;;  %v2552_v18 = vld [vmem:[#allocation29_spill] sm:$0xff] }
  0x6e   : > { %v404_v53 = vadd.f32 %v388_v59, %v351_v11  ;;  %v405_v19 = vadd.f32 %v389_v2, %v352_v54  ;;  %v441_v60 = vmul.f32 %v2548_v41, %v1901_v24  ;;  %v442_v51 = vmul.f32 %v2549_v31, %v1903_v17  ;;  %v2553_v11 = vld [vmem:[#allocation30_spill] sm:$0xff]  ;;  %v2554_v2 = vld [vmem:[#allocation32_spill] sm:$0xff] }
  0x6f   : > { %v779_v15 = vadd.f32 %v778_v50, %v763_v49  ;;  %v443_v28 = vmul.f32 %v2550_v34, %v1910_v35  ;;  %v456_v44 = vadd.f32 %v440_v23, %v402_v61  ;;  %v653_v46 = vmul.f32 %v2551_v57, %v1663_v29 }
  0x70   : > { %v457_v37 = vadd.f32 %v441_v60, %v403_v45  ;;  %v458_v7 = vadd.f32 %v442_v51, %v404_v53  ;;  %v654_v8 = vmul.f32 %v2552_v18, %v1693_v52  ;;  %v655_v54 = vmul.f32 %v2553_v11, %v1681_v47 }
  0x71   : > { %780 = vadd.xlane.f32.xlu1 %v779_v15  ;;  %v459_v59 = vadd.f32 %v443_v28, %v405_v19  ;;  %v656_v49 = vmul.f32 %v2554_v2, %v1695_v40  ;;  %v674_v50 = vmul.f32 %v2519_v3, %v1683_v63  ;;  %v675_v61 = vmul.f32 %v2520_v42, %v1697_v20 }
  0x72   : > { %v473_v23 = vadd.f32 %v457_v37, %v456_v44  ;;  %v676_v45 = vmul.f32 %v2521_v10, %v1685_v62  ;;  %v677_v53 = vmul.f32 %v2522_v48, %v1707_v13  ;;  %v711_v60 = vmul.f32 %v2525_v32, %v1899_v22 }
  0x73   : > { %v690_v19 = vadd.f32 %v674_v50, %v653_v46  ;;  %v691_v51 = vadd.f32 %v675_v61, %v654_v8  ;;  %v712_v15 = vmul.f32 %v2528_v6, %v1901_v24  ;;  %v713_v28 = vmul.f32 %v2529_v14, %v1903_v17 }
  0x74   : > { %v474_v21 = vadd.f32 %v473_v23, %v458_v7  ;;  %v692_v39 = vadd.f32 %v676_v45, %v655_v54  ;;  %v693_v44 = vadd.f32 %v677_v53, %v656_v49  ;;  %v714_v37 = vmul.f32 %v2530_v55, %v1910_v35 }
  0x75   : > { %v727_v34 = vadd.f32 %v711_v60, %v690_v19  ;;  %v728_v31 = vadd.f32 %v712_v15, %v691_v51  ;;  %v748_v41 = vmul.f32 %v2531_v5, %v1912_v38  ;;  %v749_v46 = vmul.f32 %v2532_v1, %v1914_v56 }
  0x76   : > { %v475_v8 = vadd.f32 %v474_v21, %v459_v59  ;;  %v729_v50 = vadd.f32 %v713_v28, %v692_v39  ;;  %v730_v61 = vadd.f32 %v714_v37, %v693_v44  ;;  %v750_v36 = vmul.f32 %v2533_v4, %v1922_v58 }
  0x77   : > { %v751_v7 = vmul.f32 %v2534_v27, %v1924_v26  ;;  %v764_v54 = vadd.f32 %v748_v41, %v727_v34  ;;  %v765_v49 = vadd.f32 %v749_v46, %v728_v31  ;;  %v657_v23 = vmul.f32 %v2551_v57, %v1683_v63 }
  0x78   : > { %476 = vadd.xlane.f32.xlu0 %v475_v8  ;;  %v766_v45 = vadd.f32 %v750_v36, %v729_v50  ;;  %v658_v53 = vmul.f32 %v2552_v18, %v1697_v20  ;;  %v659_v21 = vmul.f32 %v2553_v11, %v1685_v62  ;;  %v660_v39 = vmul.f32 %v2554_v2, %v1707_v13 }
  0x79   : > { %v767_v59 = vadd.f32 %v751_v7, %v730_v61  ;;  %v782_v60 = vadd.f32 %v765_v49, %v764_v54  ;;  %v678_v41 = vmul.f32 %v2519_v3, %v1899_v22  ;;  %v679_v31 = vmul.f32 %v2520_v42, %v1901_v24  ;;  %v2555_v61 = vld [vmem:[#allocation10_spill] sm:$0xff] }
  0x7a   : > { %v680_v36 = vmul.f32 %v2521_v10, %v1903_v17  ;;  %v681_v34 = vmul.f32 %v2522_v48, %v1910_v35  ;;  %v715_v57 = vmul.f32 %v2525_v32, %v1912_v38  ;;  %v716_v18 = vmul.f32 %v2528_v6, %v1914_v56 }
  0x7b   : > { %v783_v11 = vadd.f32 %v782_v60, %v766_v45  ;;  %v694_v2 = vadd.f32 %v678_v41, %v657_v23  ;;  %v695_v19 = vadd.f32 %v679_v31, %v658_v53  ;;  %v717_v3 = vmul.f32 %v2529_v14, %v1922_v58  ;;  %v2557_v23 = vld [vmem:[#allocation13_spill] sm:$0xff]  ;;  %v2558_v45 = vld [vmem:[#allocation18_spill] sm:$0xff] }
  0x7c   : > { %v696_v51 = vadd.f32 %v680_v36, %v659_v21  ;;  %v697_v42 = vadd.f32 %v681_v34, %v660_v39  ;;  %v718_v10 = vmul.f32 %v2530_v55, %v1924_v26  ;;  %v752_v15 = vmul.f32 0.0, %v2531_v5  ;;  %v2556_v55 = vld [vmem:[#allocation11_spill] sm:$0xff] }
  0x7d   : > { %v784_v48 = vadd.f32 %v783_v11, %v767_v59  ;;  %v731_v28 = vadd.f32 %v715_v57, %v694_v2  ;;  %v732_v44 = vadd.f32 %v716_v18, %v695_v19  ;;  %v753_v32 = vmul.f32 0.0, %v2532_v1  ;;  %v2559_v19 = vld [vmem:[#allocation23_spill] sm:$0xff] }
  0x7e   : > { %v733_v37 = vadd.f32 %v717_v3, %v696_v51  ;;  %v734_v6 = vadd.f32 %v718_v10, %v697_v42  ;;  %v754_v46 = vmul.f32 0.0, %v2533_v4  ;;  %v755_v8 = vmul.f32 0.0, %v2534_v27  ;;  %v2560_v51 = vld [vmem:[#allocation24_spill] sm:$0xff] }
  0x7f   : > { %785 = vadd.xlane.f32.xlu1 %v784_v48  ;;  %v768_v14 = vadd.f32 %v752_v15, %v731_v28  ;;  %v769_v50 = vadd.f32 %v753_v32, %v732_v44  ;;  %v299_v7 = vmul.f32 %v1663_v29, %v2555_v61  ;;  %v300_v5 = vmul.f32 %v1693_v52, %v2556_v55  ;;  %v2561_v32 = vld [vmem:[#allocation38_spill] sm:$0xff] }
  0x80   : > { %v770_v54 = vadd.f32 %v754_v46, %v733_v37  ;;  %v771_v49 = vadd.f32 %v755_v8, %v734_v6  ;;  %v301_v1 = vmul.f32 %v1681_v47, %v2557_v23  ;;  %v302_v53 = vmul.f32 %v1695_v40, %v2558_v45  ;;  %v2562_v6 = vld [vmem:[#allocation44_spill] sm:$0xff]  ;;  %v2563_v8 = vld [vmem:[#allocation61_spill] sm:$0xff] }
  0x81   : > { %v787_v4 = vadd.f32 %v769_v50, %v768_v14  ;;  %v337_v27 = vmul.f32 %v2535_v30, %v1683_v63  ;;  %v338_v21 = vmul.f32 %v2536_v43, %v1697_v20  ;;  %v339_v39 = vmul.f32 %v2537_v25, %v1685_v62 }
  0x82   : > { %v340_v59 = vmul.f32 %v2538_v9, %v1707_v13  ;;  %v390_v60 = vmul.f32 %v2539_v16, %v1899_v22  ;;  %v391_v41 = vmul.f32 %v2542_v33, %v1901_v24  ;;  %v392_v31 = vmul.f32 %v2545_v12, %v1903_v17 }
  0x83   : > { %v788_v36 = vadd.f32 %v787_v4, %v770_v54  ;;  %v353_v34 = vadd.f32 %v337_v27, %v299_v7  ;;  %v354_v57 = vadd.f32 %v338_v21, %v300_v5  ;;  %v355_v18 = vadd.f32 %v339_v39, %v301_v1  ;;  %v2564_v5 = vld [vmem:[#allocation62_spill] sm:$0xff]  ;;  %v2566_v27 = vld [vmem:[#allocation65_spill] sm:$0xff]  ;;  %v2567_v39 = vld [vmem:[#allocation63_spill] sm:$0xff] }
  0x84   : > { %v356_v11 = vadd.f32 %v340_v59, %v302_v53  ;;  %v393_v2 = vmul.f32 %v2546_v0, %v1910_v35  ;;  %v444_v3 = vmul.f32 %v2559_v19, %v1912_v38  ;;  %v445_v42 = vmul.f32 %v2560_v51, %v1914_v56  ;;  %v2572_v19 = vld [vmem:[#allocation69_spill] sm:$0xff]  ;;  %v2573_v51 = vld [vmem:[#allocation70_spill] sm:$0xff] }
  0x85   : > { %v789_v10 = vadd.f32 %v788_v36, %v771_v49  ;;  %v406_v15 = vadd.f32 %v390_v60, %v353_v34  ;;  %v407_v48 = vadd.f32 %v391_v41, %v354_v57  ;;  %v408_v28 = vadd.f32 %v392_v31, %v355_v18  ;;  %v2565_v49 = vld [vmem:[#allocation64_spill] sm:$0xff]  ;;  %v2568_v41 = vld [vmem:[#allocation67_spill] sm:$0xff]  ;;  %v2570_v57 = vld [vmem:[#allocation66_spill] sm:$0xff] }
  0x86   : > { %v409_v44 = vadd.f32 %v393_v2, %v356_v11  ;;  %v446_v37 = vmul.f32 %v2561_v32, %v1922_v58  ;;  %v447_v46 = vmul.f32 %v2562_v6, %v1924_v26  ;;  %v822_v14 = vmul.f32 %v2563_v8, %v1663_v29  ;;  %v2569_v36 = vld [vmem:[#allocation68_spill] sm:$0xff] }
  0x87   : > { %790 = vadd.xlane.f32.xlu1 %v789_v10  ;;  %v460_v50 = vadd.f32 %v444_v3, %v406_v15  ;;  %v461_v7 = vadd.f32 %v445_v42, %v407_v48  ;;  %v823_v54 = vmul.f32 %v2564_v5, %v1693_v52  ;;  %v824_v1 = vmul.f32 %v2565_v49, %v1681_v47  ;;  %v2571_v11 = vld [vmem:[#allocation72_spill] sm:$0xff]  ;;  %v2574_v10 = vld [vmem:[#allocation71_spill] sm:$0xff] }
  0x88   : > { %v462_v53 = vadd.f32 %v446_v37, %v408_v28  ;;  %v463_v4 = vadd.f32 %v447_v46, %v409_v44  ;;  %v825_v21 = vmul.f32 %v2566_v27, %v1695_v40  ;;  %v838_v59 = vadd.f32 %v822_v14, %v2567_v39  ;;  %v2575_v44 = vld [vmem:[#allocation73_spill] sm:$0xff]  ;;  %v2576_v37 = vld [vmem:[#allocation74_spill] sm:$0xff] }
  0x89   : > { %v478_v60 = vadd.f32 %v461_v7, %v460_v50  ;;  %v839_v31 = vadd.f32 %v823_v54, %v2568_v41  ;;  %v840_v34 = vadd.f32 %v824_v1, %v2569_v36  ;;  %v859_v18 = vmul.f32 %v2570_v57, %v1683_v63  ;;  %v2577_v7 = vld [vmem:[#allocation75_spill] sm:$0xff] }
  0x8a   : > { %v841_v2 = vadd.f32 %v825_v21, %v2571_v11  ;;  %v860_v3 = vmul.f32 %v2572_v19, %v1697_v20  ;;  %v861_v42 = vmul.f32 %v2573_v51, %v1685_v62  ;;  %v862_v15 = vmul.f32 %v2574_v10, %v1707_v13  ;;  %v2578_v21 = vld [vmem:[#allocation76_spill] sm:$0xff] }
  0x8b   : > { %v479_v48 = vadd.f32 %v478_v60, %v462_v53  ;;  %v875_v28 = vadd.f32 %v859_v18, %v838_v59  ;;  %v896_v32 = vmul.f32 %v2575_v44, %v1899_v22  ;;  %v897_v6 = vmul.f32 %v2576_v37, %v1901_v24 }
  0x8c   : > { %v876_v46 = vadd.f32 %v860_v3, %v839_v31  ;;  %v877_v14 = vadd.f32 %v861_v42, %v840_v34  ;;  %v878_v50 = vadd.f32 %v862_v15, %v841_v2  ;;  %v898_v54 = vmul.f32 %v2577_v7, %v1903_v17 }
  0x8d   : > { %v480_v1 = vadd.f32 %v479_v48, %v463_v4  ;;  %v899_v39 = vmul.f32 %v2578_v21, %v1910_v35  ;;  %v912_v41 = vadd.f32 %v896_v32, %v875_v28  ;;  %v303_v53 = vmul.f32 %v1683_v63, %v2555_v61 }
  0x8e   : > { %v913_v59 = vadd.f32 %v897_v6, %v876_v46  ;;  %v914_v60 = vadd.f32 %v898_v54, %v877_v14  ;;  %v304_v36 = vmul.f32 %v1697_v20, %v2556_v55  ;;  %v305_v31 = vmul.f32 %v1685_v62, %v2557_v23  ;;  %v2581_v54 = vld [vmem:[#allocation59_spill] sm:$0xff] }
  0x8f   : > { %481 = vadd.xlane.f32.xlu0 %v480_v1  ;;  %v915_v34 = vadd.f32 %v899_v39, %v878_v50  ;;  %v306_v4 = vmul.f32 %v1707_v13, %v2558_v45  ;;  %v341_v18 = vmul.f32 %v2535_v30, %v1899_v22  ;;  %v342_v11 = vmul.f32 %v2536_v43, %v1901_v24  ;;  %v2582_v1 = vld [vmem:[#allocation31_spill] sm:$0xff] }
  0x90   : > { %v929_v61 = vadd.f32 %v913_v59, %v912_v41  ;;  %v343_v2 = vmul.f32 %v2537_v25, %v1903_v17  ;;  %v344_v55 = vmul.f32 %v2538_v9, %v1910_v35  ;;  %v394_v23 = vmul.f32 %v2539_v16, %v1912_v38  ;;  %v2579_v9 = vld [vmem:[#allocation57_spill] sm:$0xff]  ;;  %v2580_v16 = vld [vmem:[#allocation58_spill] sm:$0xff] }
  0x91   : > { %v357_v3 = vadd.f32 %v341_v18, %v303_v53  ;;  %v358_v42 = vadd.f32 %v342_v11, %v304_v36  ;;  %v395_v45 = vmul.f32 %v2542_v33, %v1914_v56  ;;  %v396_v30 = vmul.f32 %v2545_v12, %v1922_v58  ;;  %v2583_v41 = vld [vmem:[#allocation37_spill] sm:$0xff] }
  0x92   : > { %v930_v15 = vadd.f32 %v929_v61, %v914_v60  ;;  %v359_v43 = vadd.f32 %v343_v2, %v305_v31  ;;  %v360_v48 = vadd.f32 %v344_v55, %v306_v4  ;;  %v397_v25 = vmul.f32 %v2546_v0, %v1924_v26  ;;  %v2584_v0 = vld [vmem:[#allocation60_spill] sm:$0xff]  ;;  %v2585_v36 = vld [vmem:[#allocation45_spill] sm:$0xff] }
  0x93   : > { %v410_v28 = vadd.f32 %v394_v23, %v357_v3  ;;  %v411_v32 = vadd.f32 %v395_v45, %v358_v42  ;;  %v809_v6 = vmul.f32 %v2579_v9, %v1683_v63  ;;  %v810_v46 = vmul.f32 %v2580_v16, %v1697_v20  ;;  %v2586_v4 = vld [vmem:[#allocation48_spill] sm:$0xff] }
  0x94   : > { %v931_v14 = vadd.f32 %v930_v15, %v915_v34  ;;  %v412_v50 = vadd.f32 %v396_v30, %v359_v43  ;;  %v413_v33 = vadd.f32 %v397_v25, %v360_v48  ;;  %v811_v12 = vmul.f32 %v2581_v54, %v1685_v62 }
  0x95   : > { %v464_v39 = vadd.f32 %v2582_v1, %v410_v28  ;;  %v465_v53 = vadd.f32 %v2583_v41, %v411_v32  ;;  %v812_v59 = vmul.f32 %v2584_v0, %v1707_v13  ;;  %v830_v60 = vmul.f32 %v2563_v8, %v1899_v22 }
  0x96   : > { %932 = vadd.xlane.f32.xlu1 %v931_v14  ;;  %v466_v31 = vadd.f32 %v2585_v36, %v412_v50  ;;  %v467_v34 = vadd.f32 %v2586_v4, %v413_v33  ;;  %v831_v18 = vmul.f32 %v2564_v5, %v1901_v24  ;;  %v832_v11 = vmul.f32 %v2565_v49, %v1903_v17 }
  0x97   : > { %v483_v61 = vadd.f32 %v465_v53, %v464_v39  ;;  %v833_v2 = vmul.f32 %v2566_v27, %v1910_v35  ;;  %v846_v55 = vadd.f32 %v830_v60, %v809_v6  ;;  %v867_v23 = vmul.f32 %v2570_v57, %v1912_v38  ;;  %v1237_v6 = vld [vmem:[#allocation2] sm:$0xff] }
  0x98   : > { %v847_v3 = vadd.f32 %v831_v18, %v810_v46  ;;  %v848_v42 = vadd.f32 %v832_v11, %v811_v12  ;;  %v868_v45 = vmul.f32 %v2572_v19, %v1914_v56  ;;  %v869_v30 = vmul.f32 %v2573_v51, %v1922_v58 }
  0x99   : > { %v484_v15 = vadd.f32 %v483_v61, %v466_v31  ;;  %v849_v43 = vadd.f32 %v833_v2, %v812_v59  ;;  %v870_v48 = vmul.f32 %v2574_v10, %v1924_v26  ;;  %v883_v25 = vadd.f32 %v867_v23, %v846_v55 }
  0x9a   : > { %v884_v28 = vadd.f32 %v868_v45, %v847_v3  ;;  %v885_v32 = vadd.f32 %v869_v30, %v848_v42  ;;  %v904_v14 = vmul.f32 %v1237_v6, %v2575_v44  ;;  %v905_v46 = vmul.f32 %v1237_v6, %v2576_v37 }
  0x9b   : > { %v485_v50 = vadd.f32 %v484_v15, %v467_v34  ;;  %v886_v33 = vadd.f32 %v870_v48, %v849_v43  ;;  %v906_v12 = vmul.f32 %v1237_v6, %v2577_v7  ;;  %v907_v1 = vmul.f32 %v1237_v6, %v2578_v21 }
  0x9c   : > { %v920_v39 = vadd.f32 %v904_v14, %v883_v25  ;;  %v921_v41 = vadd.f32 %v905_v46, %v884_v28  ;;  %v805_v53 = vmul.f32 %v2579_v9, %v1663_v29  ;;  %v806_v59 = vmul.f32 %v2580_v16, %v1693_v52 }
  0x9d   : > { %486 = vadd.xlane.f32.xlu0 %v485_v50  ;;  %v922_v60 = vadd.f32 %v906_v12, %v885_v32  ;;  %v923_v36 = vadd.f32 %v907_v1, %v886_v33  ;;  %v807_v31 = vmul.f32 %v2581_v54, %v1681_v47  ;;  %v808_v4 = vmul.f32 %v2584_v0, %v1695_v40 }
  0x9e   : > { %v939_v34 = vadd.f32 %v921_v41, %v920_v39  ;;  %v826_v18 = vmul.f32 %v2563_v8, %v1683_v63  ;;  %v827_v11 = vmul.f32 %v2564_v5, %v1697_v20  ;;  %v828_v29 = vmul.f32 %v2565_v49, %v1685_v62 }
  0x9f   : > { %v829_v52 = vmul.f32 %v2566_v27, %v1707_v13  ;;  %v863_v9 = vmul.f32 %v2570_v57, %v1899_v22  ;;  %v864_v47 = vmul.f32 %v2572_v19, %v1901_v24  ;;  %v865_v40 = vmul.f32 %v2573_v51, %v1903_v17 }
  0xa0   : > { %v940_v16 = vadd.f32 %v939_v34, %v922_v60  ;;  %v842_v63 = vadd.f32 %v826_v18, %v805_v53  ;;  %v843_v8 = vadd.f32 %v827_v11, %v806_v59  ;;  %v844_v54 = vadd.f32 %v828_v29, %v807_v31 }
  0xa1   : > { %v845_v20 = vadd.f32 %v829_v52, %v808_v4  ;;  %v866_v62 = vmul.f32 %v2574_v10, %v1910_v35  ;;  %v900_v13 = vmul.f32 %v2575_v44, %v1912_v38  ;;  %v901_v22 = vmul.f32 %v2576_v37, %v1914_v56 }
  0xa2   : > { %v941_v5 = vadd.f32 %v940_v16, %v923_v36  ;;  %v879_v49 = vadd.f32 %v863_v9, %v842_v63  ;;  %v880_v24 = vadd.f32 %v864_v47, %v843_v8  ;;  %v881_v27 = vadd.f32 %v865_v40, %v844_v54 }
  0xa3   : > { %v882_v57 = vadd.f32 %v866_v62, %v845_v20  ;;  %v902_v17 = vmul.f32 %v2577_v7, %v1922_v58  ;;  %v903_v19 = vmul.f32 %v2578_v21, %v1924_v26  ;;  %v1303_v10 = vmov 0  }
  0xa4   : > { %942 = vadd.xlane.f32.xlu1 %v941_v5  ;;  %v916_v51 = vadd.f32 %v900_v13, %v879_v49  ;;  %v917_v35 = vadd.f32 %v901_v22, %v880_v24  ;;  %1227 = vset.pattern.permute.xlu0 %v1303_v10  ;;  %v993_v42 = vstv %s992_s29  ;;  %v1014_v20 = vlaneseq }
  0xa5   : > { %v918_v38 = vadd.f32 %v902_v17, %v881_v27  ;;  %1228 = vset.pattern.permute.xlu1 %v1303_v10  ;;  %v919_v44 = vadd.f32 %v903_v19, %v882_v57 }
  0xa6   : > { %v934_v56 = vadd.f32 %v917_v35, %v916_v51  ;;  %v1015_v13 = vand.u32 127, %v1014_v20  ;;  %v1017_v22 = vshrl.u32 %v1014_v20, 7 }
  0xa8   : > { %v935_v37 = vadd.f32 %v934_v56, %v918_v38  ;;  %v1018_v5 = vsub.s32 %v1015_v13, %v1017_v22 }
  0xaa   : > { %v936_v0 = vadd.f32 %v935_v37, %v919_v44 }
  0xac   : > { %937 = vadd.xlane.f32.xlu0 %v936_v0 }
  0xd1   : > { %v624_v61 = vpop.xlane.xlu0 %623  ;;  %v472_v7 = vpop.xlane.xlu1 %471 }
  0xd2   : > { %v948_v55 = vrot.slane %v624_v61, 1 }
  0xd4   : > { %v956_v23 = vadd.f32 %v948_v55, %v472_v7 }
  0xd6   : > { %v776_v2 = vpop.xlane.xlu0 %775 }
  0xd7   : > { %v964_v58 = vrot.slane %v776_v2, 2 }
  0xd9   : > { %v972_v21 = vadd.f32 %v964_v58, %v956_v23 }
  0xe7   : > { %v634_v15 = vpop.xlane.xlu1 %633 }
  0xe8   : > { %v950_v60 = vrot.slane %v634_v15, 1 }
  0xe9   : > { %v928_v26 = vpop.xlane.xlu0 %927 }
  0xea   : > { %v980_v3 = vrot.slane %v928_v26, 3 }
  0xec   : > { %v988_v45 = vadd.f32 %v980_v3, %v972_v21 }
  0xee   : > { %v994_v30 = vadd.f32 %v993_v42, %v988_v45 }
  0xf0   : > { %1003 = vperm.xlu0 %1227, %v994_v30  }
  0xf1   : > { %v639_v43 = vpop.xlane.xlu1 %638 }
  0xf2   : > { %v951_v36 = vrot.slane %v639_v43, 1 }
  0xf7   : > { %v629_v25 = vpop.xlane.xlu0 %628 }
  0xf8   : > { %v949_v14 = vrot.slane %v629_v25, 1 }
  0xfe   : > { %v781_v48 = vpop.xlane.xlu1 %780 }
  0xff   : > { %v965_v50 = vrot.slane %v781_v48, 2 }
 0x105   : > { %v477_v32 = vpop.xlane.xlu0 %476 }
 0x106   : > { %v957_v46 = vadd.f32 %v949_v14, %v477_v32 }
 0x108   : > { %v973_v12 = vadd.f32 %v965_v50, %v957_v46 }
 0x10c   : > { %v786_v28 = vpop.xlane.xlu1 %785 }
 0x10d   : > { %v966_v34 = vrot.slane %v786_v28, 2 }
 0x114   : > { %v791_v6 = vpop.xlane.xlu1 %790 }
 0x115   : > { %v967_v29 = vrot.slane %v791_v6, 2 }
 0x11c   : > { %v482_v53 = vpop.xlane.xlu0 %481 }
 0x11d   : > { %v958_v31 = vadd.f32 %v950_v60, %v482_v53 }
 0x11f   : > { %v974_v52 = vadd.f32 %v966_v34, %v958_v31 }
 0x123   : > { %v933_v33 = vpop.xlane.xlu1 %932 }
 0x124   : > { %v981_v1 = vrot.slane %v933_v33, 3 }
 0x126   : > { %v989_v39 = vadd.f32 %v981_v1, %v973_v12 }
 0x128   : > { %v995_v41 = vadd.f32 %v993_v42, %v989_v39 }
 0x12a   : > { %1006 = vperm.xlu1 %1228, %v995_v41   ;;  %v487_v59 = vpop.xlane.xlu0 %486 }
 0x12b   : > { %v959_v18 = vadd.f32 %v951_v36, %v487_v59 }
 0x12d   : > { %v975_v40 = vadd.f32 %v967_v29, %v959_v18 }
 0x131   : > { %v943_v4 = vpop.xlane.xlu1 %942 }
 0x132   : > { %v983_v9 = vrot.slane %v943_v4, 3 }
 0x134   : > { %v991_v63 = vadd.f32 %v983_v9, %v975_v40 }
 0x136   : > { %v997_v54 = vadd.f32 %v993_v42, %v991_v63 }
 0x139   : > { %v938_v11 = vpop.xlane.xlu0 %937 }
 0x13a   : > { %v982_v47 = vrot.slane %v938_v11, 3 }
 0x13c   : > { %v990_v16 = vadd.f32 %v982_v47, %v974_v52 }
 0x13e   : > { %v996_v8 = vadd.f32 %v993_v42, %v990_v16 }
 0x140   : > { %1009 = vperm.xlu1 %1228, %v996_v8  }
 0x144   : > { %1012 = vperm.xlu1 %1228, %v997_v54  }
 0x16f   : > { %v1004_v49 = vpop.permute.xlu0 %1003 }
 0x170   : > { %v1019_v17 = vrot.slane %v1004_v49, %v1018_v5 }
 0x1a9   : > { %v1007_v62 = vpop.permute.xlu1 %1006 }
 0x1aa   : > { %v1023_v27 = vrot.slane %v1007_v62, %v1018_v5 }
 0x1ac   : > { %v1033_v51 = vsel %vm1032_vm0, %v1023_v27, %v1019_v17 }
 0x1bf   : > { %v1010_v24 = vpop.permute.xlu1 %1009 }
 0x1c0   : > { %v1027_v57 = vrot.slane %v1010_v24, %v1018_v5 }
 0x1c2   : > { %v1035_v10 = vsel %vm1034_vm1, %v1027_v57, %v1033_v51 }
 0x1c3   : > { %v1013_v19 = vpop.permute.xlu1 %1012 }
 0x1c4   : > { %v1031_v35 = vrot.slane %v1013_v19, %v1018_v5 }
 0x1c6   : > { %v1037_v38 = vsel %vm1036_vm2, %v1031_v35, %v1035_v10 }
 0x1c7   : > { %1040 = vst.msk [vmem:[%s164_s6] sm:$0xf] %vm1039_vm3, %v1037_v38 }
 0x1c8   : > { %1251 = shalt.err (!%p1248_p3)
}
 0x1c9   : > { %s1252_s18 = scalar_lea.hbm %s2282_s9, 64  ;;  %s1256_s25 = scalar_lea.hbm %s2327_s3, 128 }
 0x1ca   : > { %p1253_p4 = scmp.ne.s32.totalorder %s2282_s9, %s1252_s18  ;;  %p1257_p9 = scmp.lt.u32.totalorder %s2282_s9, %s2327_s3 }
 0x1cb   : > { %p1258_p10 = scmp.lt.u32.totalorder %s1256_s25, %s1252_s18  ;;  %p1260_p12 = scmp.lt.u32.totalorder %s1252_s18, %s2282_s9 }
 0x1cc   : > { %p1254_p7 = pnand %p1253_p4, %p1366_p5 }
 0x1cd   : > { %p1259_p11 = por %p1258_p10, %p1257_p9 }
 0x1ce   : > { %p1255_p8 = pneg %p1254_p7 }
 0x1cf   : > { %p1261_p13 = por %p1260_p12, %p1259_p11 }
 0x1d1   : > { %p1262_p0 = pnand %p1261_p13, %p1255_p8 }
 0x1d3   : > { %1265 = shalt.err (!%p1262_p0)
}
 0x1d4   : > { %1186 = dma.vmem_to_hbm [thread:$0]  (%p1366_p5), %s2284_s7, 64, %s2282_s9, %s1042_s2  }
 0x1d5 PF: > { %p1192_p1 = scmp.ge.s32.totalorder %s1300_s17, 2  ;;  %s1067_s29 = sand.u32 1, %s1288_s14  }
 0x1d6   : > { %s1068_s30 = scalar_lea.sflag [#allocation5], %s1067_s29 }
 0x1d7   : > { %p1189_p2 = pnand %p1192_p1, %p1370_p6 }
 0x1d9   : > { %1283 = dma.done.wait (!%p1189_p2), %s1068_s30, 64  }
 0x1da   : > { %1285 = vsyncadd (!%p1189_p2), %s1068_s30, 4294967232  ;;  %p14_p3 = scmp.ge.s32.totalorder %s1353_s19, 4   ;;  %s2587_s14 = smov %s1292_s15 }
 0x1db   : > { %s2588_s15 = smov %s1296_s16  ;;  %s2589_s16 = smov %s1364_s22 }
 0x1dc   : > { %s2590_s17 = smov %s1353_s19  ;;  %16 = sbr.rel (!%p14_p3) target bundleno = 5 (0x5), region = 85 }
 0x1e3   :  { %1073 = vsyncpa [#allocation5], 1 }
 0x1e4   :  { %1075 = vsyncpa [#allocation5 + $0x1], 1 }

</bundles_post_ra>
